<compile_context>
chip_gen: v7x
topology: tpu7x:2x2x1
jax: 0.10.0
libtpu: 0.0.40
codegen_flags: <defaults>
</compile_context>

<pallas_src>
import jax
import jax.numpy as jnp
from jax.experimental import pallas as pl
from jax.experimental.pallas import tpu as pltpu

INPUT = 3
HIDDEN = 64
SEQ = 3          # forward concatenates exactly time steps 0,1,2
EPS = 1e-5
WDTYPE = jnp.bfloat16   # MXU weight dtype; accumulation stays f32

# ---- bf16 weight slab row offsets (256 lanes wide) --------------------------
W_WH = 0          # (64, 256)  LSTM h->gates, order (i,f,o,g), i/f/o pre-scaled by 0.5
W_L1 = 64         # (64,  64)  l1
W_L2 = 128        # (192, 128) l2
W_L5 = 320        # (128, 256) l5l | l5t fused
W_HEAD = 448      # (256, 128) block-diagonal l6l (cols 0:2) / l6t (col 2)
W_ROWS = 704

# ---- f32 vector slab row offsets (256 lanes wide) ---------------------------
V_WI = 0          # rows 0:3   x->gates rows (one per input feature), pre-scaled like Wh
V_BG = 3          # row  3     fused LSTM bias (b_ih + b_hh), pre-scaled
V_L5B, V_G5, V_B5 = 4, 5, 6
V_L1B = 7
V_G1 = 8          # rows 8:11  BN1 gamma, one 64-wide chunk per time step
V_B1 = 11         # rows 11:14 BN1 beta
V_L2B, V_G2, V_B2, V_HEADB = 14, 15, 16, 17
V_ROWS = 18


def _bn_relu(x, gamma, beta):
    """Training-mode BatchNorm1d (biased batch variance, eps=1e-5) + ReLU.

    Single-pass statistics: sum and sum-of-squares are independent XLU
    reductions; var = E[x^2] - mean^2; the affine part folds to one FMA.
    """
    inv_n = 1.0 / x.shape[0]
    s1 = jnp.sum(x, axis=0, keepdims=True)
    s2 = jnp.sum(x * x, axis=0, keepdims=True)
    mean = s1 * inv_n
    var = jnp.maximum(s2 * inv_n - mean * mean, 0.0)   # guard tiny cancellation
    scale = gamma * jax.lax.rsqrt(var + EPS)
    shift = beta - mean * scale
    return jnp.maximum(x * scale + shift, 0.0)


def _forward(x, w, v):
    """Fused forward pass.

    Works identically on Pallas VMEM refs (in-kernel; slicing loads) and on
    plain jnp arrays (pure-JAX reference).

    x: (SEQ, B, INPUT) f32   w: (704, 256) bf16 slab   v: (18, 256) f32 slab
    returns (B, 128) f32 lane-dense slab (xl in cols 0:2, xt in col 2).
    """
    B = x.shape[1]

    wh = w[W_WH:W_WH + HIDDEN, :]                       # (64, 256) bf16
    l1w = w[W_L1:W_L1 + HIDDEN, 0:HIDDEN]               # (64, 64)  bf16
    wi = v[V_WI:V_WI + INPUT, :]                        # (3, 256)  f32
    bg = v[V_BG:V_BG + 1, :]                            # (1, 256)  f32
    l1b = v[V_L1B:V_L1B + 1, 0:HIDDEN]                  # (1, 64)   f32

    h = jnp.zeros((B, HIDDEN), jnp.float32)
    c = jnp.zeros((B, HIDDEN), jnp.float32)
    feat2 = jnp.zeros((B, 2 * HIDDEN), jnp.float32)

    for t in range(SEQ):                                # static unroll (SEQ == 3)
        xt = x[t]                                       # (B, 3)
        # Input projection as VPU broadcast-FMAs (K=3 is too shallow for the
        # MXU); independent of h, so it overlaps with the recurrent matmul.
        xproj = (xt[:, 0:1] * wi[0:1, :]
                 + xt[:, 1:2] * wi[1:2, :]
                 + xt[:, 2:3] * wi[2:3, :] + bg)
        gates = xproj + jnp.dot(h.astype(wh.dtype), wh,
                                preferred_element_type=jnp.float32)
        # Gate order (i, f, o, g); the (i,f,o) columns were pre-scaled by 0.5
        # at pack time, so one 256-lane tanh yields all four activations:
        #   sigmoid(z) = 0.5*tanh(z/2) + 0.5.
        tg = jnp.tanh(gates)
        ifo = 0.5 * tg[:, 0:3 * HIDDEN] + 0.5
        i_g = ifo[:, 0:HIDDEN]
        f_g = ifo[:, HIDDEN:2 * HIDDEN]
        o_g = ifo[:, 2 * HIDDEN:3 * HIDDEN]
        g_g = tg[:, 3 * HIDDEN:4 * HIDDEN]
        c = f_g * c + i_g * g_g
        h = o_g * jnp.tanh(c)

        # l1 per step, BN1+ReLU on this 64-wide chunk (per-feature stats are
        # chunk-independent), then fold into l2 via the matching row block:
        #   cat(chunks) @ l2w == sum_t chunk_t @ l2w[64t:64(t+1), :]
        out_t = jnp.dot(h.astype(l1w.dtype), l1w,
                        preferred_element_type=jnp.float32) + l1b
        bn_t = _bn_relu(out_t,
                        v[V_G1 + t:V_G1 + t + 1, 0:HIDDEN],
                        v[V_B1 + t:V_B1 + t + 1, 0:HIDDEN])
        feat2 = feat2 + jnp.dot(
            bn_t.astype(WDTYPE),
            w[W_L2 + HIDDEN * t:W_L2 + HIDDEN * (t + 1), 0:2 * HIDDEN],
            preferred_element_type=jnp.float32)

    feat2 = _bn_relu(feat2 + v[V_L2B:V_L2B + 1, 0:2 * HIDDEN],
                     v[V_G2:V_G2 + 1, 0:2 * HIDDEN],
                     v[V_B2:V_B2 + 1, 0:2 * HIDDEN])

    # Fused l5l|l5t -> (B, 256); BN5l|BN5t are per-feature, so fusing is exact.
    branch = jnp.dot(feat2.astype(WDTYPE), w[W_L5:W_L5 + 2 * HIDDEN, :],
                     preferred_element_type=jnp.float32) + v[V_L5B:V_L5B + 1, :]
    branch = _bn_relu(branch, v[V_G5:V_G5 + 1, :], v[V_B5:V_B5 + 1, :])

    # Block-diagonal head: lane-dense (B, 128) slab; cols 0:2 = xl, col 2 = xt.
    return (jnp.dot(branch.astype(WDTYPE),
                    w[W_HEAD:W_HEAD + 4 * HIDDEN, 0:2 * HIDDEN],
                    preferred_element_type=jnp.float32)
            + v[V_HEADB:V_HEADB + 1, 0:2 * HIDDEN])


def rnn_kernel(x_ref, w_ref, v_ref, out_ref):
    out_ref[...] = _forward(x_ref, w_ref, v_ref)


def make_params(key):
    """Deterministic parameter init matching the PyTorch module's shapes."""
    def uni(k, shape, bound):
        return jax.random.uniform(k, shape, jnp.float32, -bound, bound)

    keys = iter(jax.random.split(key, 64))
    klstm = 1.0 / jnp.sqrt(HIDDEN)

    p = {}
    # LSTM: per-gate (i, f, g, o), weights stored transposed (in, out).
    for name in ("i", "f", "g", "o"):
        p[f"wi_{name}"] = uni(next(keys), (INPUT, HIDDEN), klstm)
        p[f"wh_{name}"] = uni(next(keys), (HIDDEN, HIDDEN), klstm)
        b_ih = uni(next(keys), (1, HIDDEN), klstm)
        b_hh = uni(next(keys), (1, HIDDEN), klstm)
        p[f"b_{name}"] = b_ih + b_hh

    def linear(fan_in, fan_out):
        k = 1.0 / jnp.sqrt(fan_in)
        w = uni(next(keys), (fan_in, fan_out), k)     # transposed vs PyTorch
        b = uni(next(keys), (1, fan_out), k)
        return w, b

    p["l1w"], p["l1b"] = linear(64, 64)
    p["g1"], p["b1"] = jnp.ones((1, 192), jnp.float32), jnp.zeros((1, 192), jnp.float32)
    p["l2w"], p["l2b"] = linear(192, 128)
    p["g2"], p["b2"] = jnp.ones((1, 128), jnp.float32), jnp.zeros((1, 128), jnp.float32)
    p["l5lw"], p["l5lb"] = linear(128, 128)
    p["g5l"], p["b5l"] = jnp.ones((1, 128), jnp.float32), jnp.zeros((1, 128), jnp.float32)
    p["l6lw"], p["l6lb"] = linear(128, 2)
    p["l5tw"], p["l5tb"] = linear(128, 128)
    p["g5t"], p["b5t"] = jnp.ones((1, 128), jnp.float32), jnp.zeros((1, 128), jnp.float32)
    p["l6tw"], p["l6tb"] = linear(128, 1)
    return p


def pack_params(p):
    """Pack the 33 PyTorch-style tensors into 2 lane-dense kernel slabs."""
    # Gate order (i, f, o, g): the three sigmoid gates are contiguous so their
    # 0.5 pre-scale (sigmoid(z) = 0.5*tanh(z/2)+0.5) is a single lane range.
    order = ("i", "f", "o", "g")
    wi = jnp.concatenate([p[f"wi_{n}"] for n in order], axis=1)      # (3, 256)
    wh = jnp.concatenate([p[f"wh_{n}"] for n in order], axis=1)      # (64, 256)
    bg = jnp.concatenate([p[f"b_{n}"] for n in order], axis=1)       # (1, 256)
    gate_scale = jnp.concatenate(
        [jnp.full((1, 3 * HIDDEN), 0.5, jnp.float32),
         jnp.ones((1, HIDDEN), jnp.float32)], axis=1)
    wi, wh, bg = wi * gate_scale, wh * gate_scale, bg * gate_scale   # exact in bf16

    def pad256(m):
        return jnp.pad(m, ((0, 0), (0, 4 * HIDDEN - m.shape[1])))

    # Block-diagonal fused head (l6l -> cols 0:2, l6t -> col 2).
    head_w = jnp.zeros((4 * HIDDEN, 2 * HIDDEN), jnp.float32)
    head_w = head_w.at[0:128, 0:2].set(p["l6lw"])
    head_w = head_w.at[128:256, 2:3].set(p["l6tw"])
    head_b = jnp.zeros((1, 2 * HIDDEN), jnp.float32)
    head_b = head_b.at[0:1, 0:2].set(p["l6lb"])
    head_b = head_b.at[0:1, 2:3].set(p["l6tb"])

    # bf16 weight slab, 256 lanes wide.
    wslab = jnp.concatenate([
        wh,                                                   # rows 0:64
        pad256(p["l1w"]),                                     # rows 64:128
        pad256(p["l2w"]),                                     # rows 128:320
        jnp.concatenate([p["l5lw"], p["l5tw"]], axis=1),      # rows 320:448
        pad256(head_w),                                       # rows 448:704
    ], axis=0).astype(WDTYPE)

    # f32 vector slab (Wi rows + biases + BN gamma/beta), 256 lanes wide.
    vslab = jnp.concatenate([
        wi,                                                   # rows 0:3
        bg,                                                   # row 3
        jnp.concatenate([p["l5lb"], p["l5tb"]], axis=1),      # row 4
        jnp.concatenate([p["g5l"], p["g5t"]], axis=1),        # row 5
        jnp.concatenate([p["b5l"], p["b5t"]], axis=1),        # row 6
        pad256(p["l1b"]),                                     # row 7
        pad256(p["g1"].reshape(3, HIDDEN)),                   # rows 8:11
        pad256(p["b1"].reshape(3, HIDDEN)),                   # rows 11:14
        pad256(p["l2b"]),                                     # row 14
        pad256(p["g2"]),                                      # row 15
        pad256(p["b2"]),                                      # row 16
        pad256(head_b),                                       # row 17
    ], axis=0)

    assert wslab.shape == (W_ROWS, 4 * HIDDEN)
    assert vslab.shape == (V_ROWS, 4 * HIDDEN)
    return dict(wslab=wslab, vslab=vslab)


def rnn_forward(x, pk):
    """x: (batch, seq, 3) — same convention as the PyTorch module (batch_first)."""
    B, S, F = x.shape
    assert S == SEQ and F == INPUT
    # Time-major so step t is a clean leading-axis index inside the kernel.
    x3 = jnp.transpose(x, (1, 0, 2)).astype(jnp.float32)    # (SEQ, B, INPUT)

    vmem = pl.BlockSpec(memory_space=pltpu.MemorySpace.VMEM)
    out = pl.pallas_call(
        rnn_kernel,
        out_shape=jax.ShapeDtypeStruct((B, 2 * HIDDEN), jnp.float32),
        in_specs=[vmem, vmem, vmem],
        out_specs=vmem,
        compiler_params=pltpu.CompilerParams(
            vmem_limit_bytes=32 * 1024 * 1024),
    )(x3, pk["wslab"], pk["vslab"])

    return out[:, 0:2], out[:, 2:3]      # (xl, xt)


if __name__ == "__main__":
    key = jax.random.PRNGKey(0)
    kx, kp = jax.random.split(key)

    # Multiple of 8 -> full sublane use. For MXU throughput the caller should
    # raise B towards 128-256 rows per call; at B=8 the kernel is latency-bound.
    B = 8
    x = jax.random.normal(kx, (B, SEQ, INPUT), jnp.float32)
    params = make_params(kp)
    packed = pack_params(params)

    xl, xt = jax.jit(rnn_forward)(x, packed)
    jax.block_until_ready((xl, xt))

    assert xl.shape == (B, 2) and xt.shape == (B, 1)
    assert bool(jnp.all(jnp.isfinite(xl))) and bool(jnp.all(jnp.isfinite(xt)))

    # Pure-JAX reference over the identical fused math validates the lowering.
    x3 = jnp.transpose(x, (1, 0, 2)).astype(jnp.float32)
    ref = _forward(x3, packed["wslab"], packed["vslab"])
    got = jnp.concatenate([xl, xt], axis=1)
    assert bool(jnp.allclose(got, ref[:, 0:3], atol=1e-2, rtol=1e-2))

    print("KERNEL_OK")
</pallas_src>

<mosaic_0001>
module attributes {stable_mosaic.version = 11 : i64} {
  func.func @rnn_kernel(%arg0: memref<3x8x3xf32, #tpu.memory_space<vmem>>, %arg1: memref<704x256xbf16, #tpu.memory_space<vmem>>, %arg2: memref<18x256xf32, #tpu.memory_space<vmem>>, %arg3: memref<8x128xf32, #tpu.memory_space<vmem>>) attributes {dimension_semantics = [], scalar_prefetch = 0 : i64, scratch_operands = 0 : i64, tpu.core_type = #tpu.core_type<tc>} {
    %c0 = arith.constant 0 : index
    %c0_0 = arith.constant 0 : index
    %0 = vector.load %arg1[%c0, %c0_0] : memref<704x256xbf16, #tpu.memory_space<vmem>>, vector<64x256xbf16>
    %c64 = arith.constant 64 : index
    %c0_1 = arith.constant 0 : index
    %1 = vector.load %arg1[%c64, %c0_1] : memref<704x256xbf16, #tpu.memory_space<vmem>>, vector<64x64xbf16>
    %c0_2 = arith.constant 0 : index
    %c0_3 = arith.constant 0 : index
    %2 = vector.load %arg2[%c0_2, %c0_3] : memref<18x256xf32, #tpu.memory_space<vmem>>, vector<3x256xf32>
    %c3 = arith.constant 3 : index
    %c0_4 = arith.constant 0 : index
    %3 = vector.load %arg2[%c3, %c0_4] : memref<18x256xf32, #tpu.memory_space<vmem>>, vector<1x256xf32>
    %c7 = arith.constant 7 : index
    %c0_5 = arith.constant 0 : index
    %4 = vector.load %arg2[%c7, %c0_5] : memref<18x256xf32, #tpu.memory_space<vmem>>, vector<1x64xf32>
    %cst = arith.constant 0.000000e+00 : f32
    %5 = vector.broadcast %cst : f32 to vector<8x64xf32>
    %cst_6 = arith.constant 0.000000e+00 : f32
    %6 = vector.broadcast %cst_6 : f32 to vector<8x64xf32>
    %cst_7 = arith.constant 0.000000e+00 : f32
    %7 = vector.broadcast %cst_7 : f32 to vector<8x128xf32>
    %c0_8 = arith.constant 0 : index
    %c0_9 = arith.constant 0 : index
    %c0_10 = arith.constant 0 : index
    %8 = vector.load %arg0[%c0_8, %c0_9, %c0_10] : memref<3x8x3xf32, #tpu.memory_space<vmem>>, vector<1x8x3xf32>
    %9 = vector.shape_cast %8 : vector<1x8x3xf32> to vector<8x3xf32>
    %10 = vector.extract_strided_slice %9 {offsets = [0, 0], sizes = [8, 1], strides = [1, 1]} : vector<8x3xf32> to vector<8x1xf32>
    %11 = vector.extract_strided_slice %2 {offsets = [0, 0], sizes = [1, 256], strides = [1, 1]} : vector<3x256xf32> to vector<1x256xf32>
    %12 = vector.broadcast %10 : vector<8x1xf32> to vector<8x256xf32>
    %13 = vector.broadcast %11 : vector<1x256xf32> to vector<8x256xf32>
    %14 = arith.mulf %12, %13 : vector<8x256xf32>
    %15 = vector.extract_strided_slice %9 {offsets = [0, 1], sizes = [8, 1], strides = [1, 1]} : vector<8x3xf32> to vector<8x1xf32>
    %16 = vector.extract_strided_slice %2 {offsets = [1, 0], sizes = [1, 256], strides = [1, 1]} : vector<3x256xf32> to vector<1x256xf32>
    %17 = vector.broadcast %15 : vector<8x1xf32> to vector<8x256xf32>
    %18 = vector.broadcast %16 : vector<1x256xf32> to vector<8x256xf32>
    %19 = arith.mulf %17, %18 : vector<8x256xf32>
    %20 = arith.addf %14, %19 : vector<8x256xf32>
    %21 = vector.extract_strided_slice %9 {offsets = [0, 2], sizes = [8, 1], strides = [1, 1]} : vector<8x3xf32> to vector<8x1xf32>
    %22 = vector.extract_strided_slice %2 {offsets = [2, 0], sizes = [1, 256], strides = [1, 1]} : vector<3x256xf32> to vector<1x256xf32>
    %23 = vector.broadcast %21 : vector<8x1xf32> to vector<8x256xf32>
    %24 = vector.broadcast %22 : vector<1x256xf32> to vector<8x256xf32>
    %25 = arith.mulf %23, %24 : vector<8x256xf32>
    %26 = arith.addf %20, %25 : vector<8x256xf32>
    %27 = vector.broadcast %3 : vector<1x256xf32> to vector<8x256xf32>
    %28 = arith.addf %26, %27 : vector<8x256xf32>
    %29 = arith.truncf %5 : vector<8x64xf32> to vector<8x64xbf16>
    %cst_11 = arith.constant dense<0.000000e+00> : vector<8x256xf32>
    %30 = tpu.matmul %29, %0, %cst_11 {dimension_numbers = #tpu.dot_dimension_numbers<[1], [0], [0], [1], [0, 0, 1, 1], [], []>} : vector<8x64xbf16>, vector<64x256xbf16>, vector<8x256xf32> -> vector<8x256xf32>
    %31 = arith.addf %28, %30 : vector<8x256xf32>
    %32 = math.tanh %31 : vector<8x256xf32>
    %33 = vector.extract_strided_slice %32 {offsets = [0, 0], sizes = [8, 192], strides = [1, 1]} : vector<8x256xf32> to vector<8x192xf32>
    %cst_12 = arith.constant 5.000000e-01 : f32
    %34 = vector.broadcast %cst_12 : f32 to vector<8x192xf32>
    %35 = arith.mulf %34, %33 : vector<8x192xf32>
    %cst_13 = arith.constant 5.000000e-01 : f32
    %36 = vector.broadcast %cst_13 : f32 to vector<8x192xf32>
    %37 = arith.addf %35, %36 : vector<8x192xf32>
    %38 = vector.extract_strided_slice %37 {offsets = [0, 0], sizes = [8, 64], strides = [1, 1]} : vector<8x192xf32> to vector<8x64xf32>
    %39 = vector.extract_strided_slice %37 {offsets = [0, 64], sizes = [8, 64], strides = [1, 1]} : vector<8x192xf32> to vector<8x64xf32>
    %40 = vector.extract_strided_slice %37 {offsets = [0, 128], sizes = [8, 64], strides = [1, 1]} : vector<8x192xf32> to vector<8x64xf32>
    %41 = vector.extract_strided_slice %32 {offsets = [0, 192], sizes = [8, 64], strides = [1, 1]} : vector<8x256xf32> to vector<8x64xf32>
    %42 = arith.mulf %39, %6 : vector<8x64xf32>
    %43 = arith.mulf %38, %41 : vector<8x64xf32>
    %44 = arith.addf %42, %43 : vector<8x64xf32>
    %45 = math.tanh %44 : vector<8x64xf32>
    %46 = arith.mulf %40, %45 : vector<8x64xf32>
    %47 = arith.truncf %46 : vector<8x64xf32> to vector<8x64xbf16>
    %cst_14 = arith.constant dense<0.000000e+00> : vector<8x64xf32>
    %48 = tpu.matmul %47, %1, %cst_14 {dimension_numbers = #tpu.dot_dimension_numbers<[1], [0], [0], [1], [0, 0, 1, 1], [], []>} : vector<8x64xbf16>, vector<64x64xbf16>, vector<8x64xf32> -> vector<8x64xf32>
    %49 = vector.broadcast %4 : vector<1x64xf32> to vector<8x64xf32>
    %50 = arith.addf %48, %49 : vector<8x64xf32>
    %c8 = arith.constant 8 : index
    %c0_15 = arith.constant 0 : index
    %51 = vector.load %arg2[%c8, %c0_15] : memref<18x256xf32, #tpu.memory_space<vmem>>, vector<1x64xf32>
    %c11 = arith.constant 11 : index
    %c0_16 = arith.constant 0 : index
    %52 = vector.load %arg2[%c11, %c0_16] : memref<18x256xf32, #tpu.memory_space<vmem>>, vector<1x64xf32>
    %cst_17 = arith.constant dense<0.000000e+00> : vector<64xf32>
    %53 = vector.multi_reduction <add>, %50, %cst_17 [0] : vector<8x64xf32> to vector<64xf32>
    %54 = vector.shape_cast %53 : vector<64xf32> to vector<1x64xf32>
    %55 = arith.mulf %50, %50 : vector<8x64xf32>
    %cst_18 = arith.constant dense<0.000000e+00> : vector<64xf32>
    %56 = vector.multi_reduction <add>, %55, %cst_18 [0] : vector<8x64xf32> to vector<64xf32>
    %57 = vector.shape_cast %56 : vector<64xf32> to vector<1x64xf32>
    %cst_19 = arith.constant 1.250000e-01 : f32
    %58 = vector.broadcast %cst_19 : f32 to vector<1x64xf32>
    %59 = arith.mulf %54, %58 : vector<1x64xf32>
    %cst_20 = arith.constant 1.250000e-01 : f32
    %60 = vector.broadcast %cst_20 : f32 to vector<1x64xf32>
    %61 = arith.mulf %57, %60 : vector<1x64xf32>
    %62 = arith.mulf %59, %59 : vector<1x64xf32>
    %63 = arith.subf %61, %62 : vector<1x64xf32>
    %cst_21 = arith.constant 0.000000e+00 : f32
    %64 = vector.broadcast %cst_21 : f32 to vector<1x64xf32>
    %65 = arith.maximumf %63, %64 : vector<1x64xf32>
    %cst_22 = arith.constant 9.99999974E-6 : f32
    %66 = vector.broadcast %cst_22 : f32 to vector<1x64xf32>
    %67 = arith.addf %65, %66 : vector<1x64xf32>
    %68 = math.rsqrt %67 : vector<1x64xf32>
    %69 = arith.mulf %51, %68 : vector<1x64xf32>
    %70 = arith.mulf %59, %69 : vector<1x64xf32>
    %71 = arith.subf %52, %70 : vector<1x64xf32>
    %72 = vector.broadcast %69 : vector<1x64xf32> to vector<8x64xf32>
    %73 = arith.mulf %50, %72 : vector<8x64xf32>
    %74 = vector.broadcast %71 : vector<1x64xf32> to vector<8x64xf32>
    %75 = arith.addf %73, %74 : vector<8x64xf32>
    %cst_23 = arith.constant 0.000000e+00 : f32
    %76 = vector.broadcast %cst_23 : f32 to vector<8x64xf32>
    %77 = arith.maximumf %75, %76 : vector<8x64xf32>
    %78 = arith.truncf %77 : vector<8x64xf32> to vector<8x64xbf16>
    %c128 = arith.constant 128 : index
    %c0_24 = arith.constant 0 : index
    %79 = vector.load %arg1[%c128, %c0_24] : memref<704x256xbf16, #tpu.memory_space<vmem>>, vector<64x128xbf16>
    %cst_25 = arith.constant dense<0.000000e+00> : vector<8x128xf32>
    %80 = tpu.matmul %78, %79, %cst_25 {dimension_numbers = #tpu.dot_dimension_numbers<[1], [0], [0], [1], [0, 0, 1, 1], [], []>} : vector<8x64xbf16>, vector<64x128xbf16>, vector<8x128xf32> -> vector<8x128xf32>
    %81 = arith.addf %7, %80 : vector<8x128xf32>
    %c1 = arith.constant 1 : index
    %c0_26 = arith.constant 0 : index
    %c0_27 = arith.constant 0 : index
    %82 = vector.load %arg0[%c1, %c0_26, %c0_27] : memref<3x8x3xf32, #tpu.memory_space<vmem>>, vector<1x8x3xf32>
    %83 = vector.shape_cast %82 : vector<1x8x3xf32> to vector<8x3xf32>
    %84 = vector.extract_strided_slice %83 {offsets = [0, 0], sizes = [8, 1], strides = [1, 1]} : vector<8x3xf32> to vector<8x1xf32>
    %85 = vector.extract_strided_slice %2 {offsets = [0, 0], sizes = [1, 256], strides = [1, 1]} : vector<3x256xf32> to vector<1x256xf32>
    %86 = vector.broadcast %84 : vector<8x1xf32> to vector<8x256xf32>
    %87 = vector.broadcast %85 : vector<1x256xf32> to vector<8x256xf32>
    %88 = arith.mulf %86, %87 : vector<8x256xf32>
    %89 = vector.extract_strided_slice %83 {offsets = [0, 1], sizes = [8, 1], strides = [1, 1]} : vector<8x3xf32> to vector<8x1xf32>
    %90 = vector.extract_strided_slice %2 {offsets = [1, 0], sizes = [1, 256], strides = [1, 1]} : vector<3x256xf32> to vector<1x256xf32>
    %91 = vector.broadcast %89 : vector<8x1xf32> to vector<8x256xf32>
    %92 = vector.broadcast %90 : vector<1x256xf32> to vector<8x256xf32>
    %93 = arith.mulf %91, %92 : vector<8x256xf32>
    %94 = arith.addf %88, %93 : vector<8x256xf32>
    %95 = vector.extract_strided_slice %83 {offsets = [0, 2], sizes = [8, 1], strides = [1, 1]} : vector<8x3xf32> to vector<8x1xf32>
    %96 = vector.extract_strided_slice %2 {offsets = [2, 0], sizes = [1, 256], strides = [1, 1]} : vector<3x256xf32> to vector<1x256xf32>
    %97 = vector.broadcast %95 : vector<8x1xf32> to vector<8x256xf32>
    %98 = vector.broadcast %96 : vector<1x256xf32> to vector<8x256xf32>
    %99 = arith.mulf %97, %98 : vector<8x256xf32>
    %100 = arith.addf %94, %99 : vector<8x256xf32>
    %101 = vector.broadcast %3 : vector<1x256xf32> to vector<8x256xf32>
    %102 = arith.addf %100, %101 : vector<8x256xf32>
    %103 = arith.truncf %46 : vector<8x64xf32> to vector<8x64xbf16>
    %cst_28 = arith.constant dense<0.000000e+00> : vector<8x256xf32>
    %104 = tpu.matmul %103, %0, %cst_28 {dimension_numbers = #tpu.dot_dimension_numbers<[1], [0], [0], [1], [0, 0, 1, 1], [], []>} : vector<8x64xbf16>, vector<64x256xbf16>, vector<8x256xf32> -> vector<8x256xf32>
    %105 = arith.addf %102, %104 : vector<8x256xf32>
    %106 = math.tanh %105 : vector<8x256xf32>
    %107 = vector.extract_strided_slice %106 {offsets = [0, 0], sizes = [8, 192], strides = [1, 1]} : vector<8x256xf32> to vector<8x192xf32>
    %cst_29 = arith.constant 5.000000e-01 : f32
    %108 = vector.broadcast %cst_29 : f32 to vector<8x192xf32>
    %109 = arith.mulf %108, %107 : vector<8x192xf32>
    %cst_30 = arith.constant 5.000000e-01 : f32
    %110 = vector.broadcast %cst_30 : f32 to vector<8x192xf32>
    %111 = arith.addf %109, %110 : vector<8x192xf32>
    %112 = vector.extract_strided_slice %111 {offsets = [0, 0], sizes = [8, 64], strides = [1, 1]} : vector<8x192xf32> to vector<8x64xf32>
    %113 = vector.extract_strided_slice %111 {offsets = [0, 64], sizes = [8, 64], strides = [1, 1]} : vector<8x192xf32> to vector<8x64xf32>
    %114 = vector.extract_strided_slice %111 {offsets = [0, 128], sizes = [8, 64], strides = [1, 1]} : vector<8x192xf32> to vector<8x64xf32>
    %115 = vector.extract_strided_slice %106 {offsets = [0, 192], sizes = [8, 64], strides = [1, 1]} : vector<8x256xf32> to vector<8x64xf32>
    %116 = arith.mulf %113, %44 : vector<8x64xf32>
    %117 = arith.mulf %112, %115 : vector<8x64xf32>
    %118 = arith.addf %116, %117 : vector<8x64xf32>
    %119 = math.tanh %118 : vector<8x64xf32>
    %120 = arith.mulf %114, %119 : vector<8x64xf32>
    %121 = arith.truncf %120 : vector<8x64xf32> to vector<8x64xbf16>
    %cst_31 = arith.constant dense<0.000000e+00> : vector<8x64xf32>
    %122 = tpu.matmul %121, %1, %cst_31 {dimension_numbers = #tpu.dot_dimension_numbers<[1], [0], [0], [1], [0, 0, 1, 1], [], []>} : vector<8x64xbf16>, vector<64x64xbf16>, vector<8x64xf32> -> vector<8x64xf32>
    %123 = vector.broadcast %4 : vector<1x64xf32> to vector<8x64xf32>
    %124 = arith.addf %122, %123 : vector<8x64xf32>
    %c9 = arith.constant 9 : index
    %c0_32 = arith.constant 0 : index
    %125 = vector.load %arg2[%c9, %c0_32] : memref<18x256xf32, #tpu.memory_space<vmem>>, vector<1x64xf32>
    %c12 = arith.constant 12 : index
    %c0_33 = arith.constant 0 : index
    %126 = vector.load %arg2[%c12, %c0_33] : memref<18x256xf32, #tpu.memory_space<vmem>>, vector<1x64xf32>
    %cst_34 = arith.constant dense<0.000000e+00> : vector<64xf32>
    %127 = vector.multi_reduction <add>, %124, %cst_34 [0] : vector<8x64xf32> to vector<64xf32>
    %128 = vector.shape_cast %127 : vector<64xf32> to vector<1x64xf32>
    %129 = arith.mulf %124, %124 : vector<8x64xf32>
    %cst_35 = arith.constant dense<0.000000e+00> : vector<64xf32>
    %130 = vector.multi_reduction <add>, %129, %cst_35 [0] : vector<8x64xf32> to vector<64xf32>
    %131 = vector.shape_cast %130 : vector<64xf32> to vector<1x64xf32>
    %cst_36 = arith.constant 1.250000e-01 : f32
    %132 = vector.broadcast %cst_36 : f32 to vector<1x64xf32>
    %133 = arith.mulf %128, %132 : vector<1x64xf32>
    %cst_37 = arith.constant 1.250000e-01 : f32
    %134 = vector.broadcast %cst_37 : f32 to vector<1x64xf32>
    %135 = arith.mulf %131, %134 : vector<1x64xf32>
    %136 = arith.mulf %133, %133 : vector<1x64xf32>
    %137 = arith.subf %135, %136 : vector<1x64xf32>
    %cst_38 = arith.constant 0.000000e+00 : f32
    %138 = vector.broadcast %cst_38 : f32 to vector<1x64xf32>
    %139 = arith.maximumf %137, %138 : vector<1x64xf32>
    %cst_39 = arith.constant 9.99999974E-6 : f32
    %140 = vector.broadcast %cst_39 : f32 to vector<1x64xf32>
    %141 = arith.addf %139, %140 : vector<1x64xf32>
    %142 = math.rsqrt %141 : vector<1x64xf32>
    %143 = arith.mulf %125, %142 : vector<1x64xf32>
    %144 = arith.mulf %133, %143 : vector<1x64xf32>
    %145 = arith.subf %126, %144 : vector<1x64xf32>
    %146 = vector.broadcast %143 : vector<1x64xf32> to vector<8x64xf32>
    %147 = arith.mulf %124, %146 : vector<8x64xf32>
    %148 = vector.broadcast %145 : vector<1x64xf32> to vector<8x64xf32>
    %149 = arith.addf %147, %148 : vector<8x64xf32>
    %cst_40 = arith.constant 0.000000e+00 : f32
    %150 = vector.broadcast %cst_40 : f32 to vector<8x64xf32>
    %151 = arith.maximumf %149, %150 : vector<8x64xf32>
    %152 = arith.truncf %151 : vector<8x64xf32> to vector<8x64xbf16>
    %c192 = arith.constant 192 : index
    %c0_41 = arith.constant 0 : index
    %153 = vector.load %arg1[%c192, %c0_41] : memref<704x256xbf16, #tpu.memory_space<vmem>>, vector<64x128xbf16>
    %cst_42 = arith.constant dense<0.000000e+00> : vector<8x128xf32>
    %154 = tpu.matmul %152, %153, %cst_42 {dimension_numbers = #tpu.dot_dimension_numbers<[1], [0], [0], [1], [0, 0, 1, 1], [], []>} : vector<8x64xbf16>, vector<64x128xbf16>, vector<8x128xf32> -> vector<8x128xf32>
    %155 = arith.addf %81, %154 : vector<8x128xf32>
    %c2 = arith.constant 2 : index
    %c0_43 = arith.constant 0 : index
    %c0_44 = arith.constant 0 : index
    %156 = vector.load %arg0[%c2, %c0_43, %c0_44] : memref<3x8x3xf32, #tpu.memory_space<vmem>>, vector<1x8x3xf32>
    %157 = vector.shape_cast %156 : vector<1x8x3xf32> to vector<8x3xf32>
    %158 = vector.extract_strided_slice %157 {offsets = [0, 0], sizes = [8, 1], strides = [1, 1]} : vector<8x3xf32> to vector<8x1xf32>
    %159 = vector.extract_strided_slice %2 {offsets = [0, 0], sizes = [1, 256], strides = [1, 1]} : vector<3x256xf32> to vector<1x256xf32>
    %160 = vector.broadcast %158 : vector<8x1xf32> to vector<8x256xf32>
    %161 = vector.broadcast %159 : vector<1x256xf32> to vector<8x256xf32>
    %162 = arith.mulf %160, %161 : vector<8x256xf32>
    %163 = vector.extract_strided_slice %157 {offsets = [0, 1], sizes = [8, 1], strides = [1, 1]} : vector<8x3xf32> to vector<8x1xf32>
    %164 = vector.extract_strided_slice %2 {offsets = [1, 0], sizes = [1, 256], strides = [1, 1]} : vector<3x256xf32> to vector<1x256xf32>
    %165 = vector.broadcast %163 : vector<8x1xf32> to vector<8x256xf32>
    %166 = vector.broadcast %164 : vector<1x256xf32> to vector<8x256xf32>
    %167 = arith.mulf %165, %166 : vector<8x256xf32>
    %168 = arith.addf %162, %167 : vector<8x256xf32>
    %169 = vector.extract_strided_slice %157 {offsets = [0, 2], sizes = [8, 1], strides = [1, 1]} : vector<8x3xf32> to vector<8x1xf32>
    %170 = vector.extract_strided_slice %2 {offsets = [2, 0], sizes = [1, 256], strides = [1, 1]} : vector<3x256xf32> to vector<1x256xf32>
    %171 = vector.broadcast %169 : vector<8x1xf32> to vector<8x256xf32>
    %172 = vector.broadcast %170 : vector<1x256xf32> to vector<8x256xf32>
    %173 = arith.mulf %171, %172 : vector<8x256xf32>
    %174 = arith.addf %168, %173 : vector<8x256xf32>
    %175 = vector.broadcast %3 : vector<1x256xf32> to vector<8x256xf32>
    %176 = arith.addf %174, %175 : vector<8x256xf32>
    %177 = arith.truncf %120 : vector<8x64xf32> to vector<8x64xbf16>
    %cst_45 = arith.constant dense<0.000000e+00> : vector<8x256xf32>
    %178 = tpu.matmul %177, %0, %cst_45 {dimension_numbers = #tpu.dot_dimension_numbers<[1], [0], [0], [1], [0, 0, 1, 1], [], []>} : vector<8x64xbf16>, vector<64x256xbf16>, vector<8x256xf32> -> vector<8x256xf32>
    %179 = arith.addf %176, %178 : vector<8x256xf32>
    %180 = math.tanh %179 : vector<8x256xf32>
    %181 = vector.extract_strided_slice %180 {offsets = [0, 0], sizes = [8, 192], strides = [1, 1]} : vector<8x256xf32> to vector<8x192xf32>
    %cst_46 = arith.constant 5.000000e-01 : f32
    %182 = vector.broadcast %cst_46 : f32 to vector<8x192xf32>
    %183 = arith.mulf %182, %181 : vector<8x192xf32>
    %cst_47 = arith.constant 5.000000e-01 : f32
    %184 = vector.broadcast %cst_47 : f32 to vector<8x192xf32>
    %185 = arith.addf %183, %184 : vector<8x192xf32>
    %186 = vector.extract_strided_slice %185 {offsets = [0, 0], sizes = [8, 64], strides = [1, 1]} : vector<8x192xf32> to vector<8x64xf32>
    %187 = vector.extract_strided_slice %185 {offsets = [0, 64], sizes = [8, 64], strides = [1, 1]} : vector<8x192xf32> to vector<8x64xf32>
    %188 = vector.extract_strided_slice %185 {offsets = [0, 128], sizes = [8, 64], strides = [1, 1]} : vector<8x192xf32> to vector<8x64xf32>
    %189 = vector.extract_strided_slice %180 {offsets = [0, 192], sizes = [8, 64], strides = [1, 1]} : vector<8x256xf32> to vector<8x64xf32>
    %190 = arith.mulf %187, %118 : vector<8x64xf32>
    %191 = arith.mulf %186, %189 : vector<8x64xf32>
    %192 = arith.addf %190, %191 : vector<8x64xf32>
    %193 = math.tanh %192 : vector<8x64xf32>
    %194 = arith.mulf %188, %193 : vector<8x64xf32>
    %195 = arith.truncf %194 : vector<8x64xf32> to vector<8x64xbf16>
    %cst_48 = arith.constant dense<0.000000e+00> : vector<8x64xf32>
    %196 = tpu.matmul %195, %1, %cst_48 {dimension_numbers = #tpu.dot_dimension_numbers<[1], [0], [0], [1], [0, 0, 1, 1], [], []>} : vector<8x64xbf16>, vector<64x64xbf16>, vector<8x64xf32> -> vector<8x64xf32>
    %197 = vector.broadcast %4 : vector<1x64xf32> to vector<8x64xf32>
    %198 = arith.addf %196, %197 : vector<8x64xf32>
    %c10 = arith.constant 10 : index
    %c0_49 = arith.constant 0 : index
    %199 = vector.load %arg2[%c10, %c0_49] : memref<18x256xf32, #tpu.memory_space<vmem>>, vector<1x64xf32>
    %c13 = arith.constant 13 : index
    %c0_50 = arith.constant 0 : index
    %200 = vector.load %arg2[%c13, %c0_50] : memref<18x256xf32, #tpu.memory_space<vmem>>, vector<1x64xf32>
    %cst_51 = arith.constant dense<0.000000e+00> : vector<64xf32>
    %201 = vector.multi_reduction <add>, %198, %cst_51 [0] : vector<8x64xf32> to vector<64xf32>
    %202 = vector.shape_cast %201 : vector<64xf32> to vector<1x64xf32>
    %203 = arith.mulf %198, %198 : vector<8x64xf32>
    %cst_52 = arith.constant dense<0.000000e+00> : vector<64xf32>
    %204 = vector.multi_reduction <add>, %203, %cst_52 [0] : vector<8x64xf32> to vector<64xf32>
    %205 = vector.shape_cast %204 : vector<64xf32> to vector<1x64xf32>
    %cst_53 = arith.constant 1.250000e-01 : f32
    %206 = vector.broadcast %cst_53 : f32 to vector<1x64xf32>
    %207 = arith.mulf %202, %206 : vector<1x64xf32>
    %cst_54 = arith.constant 1.250000e-01 : f32
    %208 = vector.broadcast %cst_54 : f32 to vector<1x64xf32>
    %209 = arith.mulf %205, %208 : vector<1x64xf32>
    %210 = arith.mulf %207, %207 : vector<1x64xf32>
    %211 = arith.subf %209, %210 : vector<1x64xf32>
    %cst_55 = arith.constant 0.000000e+00 : f32
    %212 = vector.broadcast %cst_55 : f32 to vector<1x64xf32>
    %213 = arith.maximumf %211, %212 : vector<1x64xf32>
    %cst_56 = arith.constant 9.99999974E-6 : f32
    %214 = vector.broadcast %cst_56 : f32 to vector<1x64xf32>
    %215 = arith.addf %213, %214 : vector<1x64xf32>
    %216 = math.rsqrt %215 : vector<1x64xf32>
    %217 = arith.mulf %199, %216 : vector<1x64xf32>
    %218 = arith.mulf %207, %217 : vector<1x64xf32>
    %219 = arith.subf %200, %218 : vector<1x64xf32>
    %220 = vector.broadcast %217 : vector<1x64xf32> to vector<8x64xf32>
    %221 = arith.mulf %198, %220 : vector<8x64xf32>
    %222 = vector.broadcast %219 : vector<1x64xf32> to vector<8x64xf32>
    %223 = arith.addf %221, %222 : vector<8x64xf32>
    %cst_57 = arith.constant 0.000000e+00 : f32
    %224 = vector.broadcast %cst_57 : f32 to vector<8x64xf32>
    %225 = arith.maximumf %223, %224 : vector<8x64xf32>
    %226 = arith.truncf %225 : vector<8x64xf32> to vector<8x64xbf16>
    %c256 = arith.constant 256 : index
    %c0_58 = arith.constant 0 : index
    %227 = vector.load %arg1[%c256, %c0_58] : memref<704x256xbf16, #tpu.memory_space<vmem>>, vector<64x128xbf16>
    %cst_59 = arith.constant dense<0.000000e+00> : vector<8x128xf32>
    %228 = tpu.matmul %226, %227, %cst_59 {dimension_numbers = #tpu.dot_dimension_numbers<[1], [0], [0], [1], [0, 0, 1, 1], [], []>} : vector<8x64xbf16>, vector<64x128xbf16>, vector<8x128xf32> -> vector<8x128xf32>
    %229 = arith.addf %155, %228 : vector<8x128xf32>
    %c14 = arith.constant 14 : index
    %c0_60 = arith.constant 0 : index
    %230 = vector.load %arg2[%c14, %c0_60] : memref<18x256xf32, #tpu.memory_space<vmem>>, vector<1x128xf32>
    %231 = vector.broadcast %230 : vector<1x128xf32> to vector<8x128xf32>
    %232 = arith.addf %229, %231 : vector<8x128xf32>
    %c15 = arith.constant 15 : index
    %c0_61 = arith.constant 0 : index
    %233 = vector.load %arg2[%c15, %c0_61] : memref<18x256xf32, #tpu.memory_space<vmem>>, vector<1x128xf32>
    %c16 = arith.constant 16 : index
    %c0_62 = arith.constant 0 : index
    %234 = vector.load %arg2[%c16, %c0_62] : memref<18x256xf32, #tpu.memory_space<vmem>>, vector<1x128xf32>
    %cst_63 = arith.constant dense<0.000000e+00> : vector<128xf32>
    %235 = vector.multi_reduction <add>, %232, %cst_63 [0] : vector<8x128xf32> to vector<128xf32>
    %236 = vector.shape_cast %235 : vector<128xf32> to vector<1x128xf32>
    %237 = arith.mulf %232, %232 : vector<8x128xf32>
    %cst_64 = arith.constant dense<0.000000e+00> : vector<128xf32>
    %238 = vector.multi_reduction <add>, %237, %cst_64 [0] : vector<8x128xf32> to vector<128xf32>
    %239 = vector.shape_cast %238 : vector<128xf32> to vector<1x128xf32>
    %cst_65 = arith.constant 1.250000e-01 : f32
    %240 = vector.broadcast %cst_65 : f32 to vector<1x128xf32>
    %241 = arith.mulf %236, %240 : vector<1x128xf32>
    %cst_66 = arith.constant 1.250000e-01 : f32
    %242 = vector.broadcast %cst_66 : f32 to vector<1x128xf32>
    %243 = arith.mulf %239, %242 : vector<1x128xf32>
    %244 = arith.mulf %241, %241 : vector<1x128xf32>
    %245 = arith.subf %243, %244 : vector<1x128xf32>
    %cst_67 = arith.constant 0.000000e+00 : f32
    %246 = vector.broadcast %cst_67 : f32 to vector<1x128xf32>
    %247 = arith.maximumf %245, %246 : vector<1x128xf32>
    %cst_68 = arith.constant 9.99999974E-6 : f32
    %248 = vector.broadcast %cst_68 : f32 to vector<1x128xf32>
    %249 = arith.addf %247, %248 : vector<1x128xf32>
    %250 = math.rsqrt %249 : vector<1x128xf32>
    %251 = arith.mulf %233, %250 : vector<1x128xf32>
    %252 = arith.mulf %241, %251 : vector<1x128xf32>
    %253 = arith.subf %234, %252 : vector<1x128xf32>
    %254 = vector.broadcast %251 : vector<1x128xf32> to vector<8x128xf32>
    %255 = arith.mulf %232, %254 : vector<8x128xf32>
    %256 = vector.broadcast %253 : vector<1x128xf32> to vector<8x128xf32>
    %257 = arith.addf %255, %256 : vector<8x128xf32>
    %cst_69 = arith.constant 0.000000e+00 : f32
    %258 = vector.broadcast %cst_69 : f32 to vector<8x128xf32>
    %259 = arith.maximumf %257, %258 : vector<8x128xf32>
    %260 = arith.truncf %259 : vector<8x128xf32> to vector<8x128xbf16>
    %c320 = arith.constant 320 : index
    %c0_70 = arith.constant 0 : index
    %261 = vector.load %arg1[%c320, %c0_70] : memref<704x256xbf16, #tpu.memory_space<vmem>>, vector<128x256xbf16>
    %cst_71 = arith.constant dense<0.000000e+00> : vector<8x256xf32>
    %262 = tpu.matmul %260, %261, %cst_71 {dimension_numbers = #tpu.dot_dimension_numbers<[1], [0], [0], [1], [0, 0, 1, 1], [], []>} : vector<8x128xbf16>, vector<128x256xbf16>, vector<8x256xf32> -> vector<8x256xf32>
    %c4 = arith.constant 4 : index
    %c0_72 = arith.constant 0 : index
    %263 = vector.load %arg2[%c4, %c0_72] : memref<18x256xf32, #tpu.memory_space<vmem>>, vector<1x256xf32>
    %264 = vector.broadcast %263 : vector<1x256xf32> to vector<8x256xf32>
    %265 = arith.addf %262, %264 : vector<8x256xf32>
    %c5 = arith.constant 5 : index
    %c0_73 = arith.constant 0 : index
    %266 = vector.load %arg2[%c5, %c0_73] : memref<18x256xf32, #tpu.memory_space<vmem>>, vector<1x256xf32>
    %c6 = arith.constant 6 : index
    %c0_74 = arith.constant 0 : index
    %267 = vector.load %arg2[%c6, %c0_74] : memref<18x256xf32, #tpu.memory_space<vmem>>, vector<1x256xf32>
    %cst_75 = arith.constant dense<0.000000e+00> : vector<256xf32>
    %268 = vector.multi_reduction <add>, %265, %cst_75 [0] : vector<8x256xf32> to vector<256xf32>
    %269 = vector.shape_cast %268 : vector<256xf32> to vector<1x256xf32>
    %270 = arith.mulf %265, %265 : vector<8x256xf32>
    %cst_76 = arith.constant dense<0.000000e+00> : vector<256xf32>
    %271 = vector.multi_reduction <add>, %270, %cst_76 [0] : vector<8x256xf32> to vector<256xf32>
    %272 = vector.shape_cast %271 : vector<256xf32> to vector<1x256xf32>
    %cst_77 = arith.constant 1.250000e-01 : f32
    %273 = vector.broadcast %cst_77 : f32 to vector<1x256xf32>
    %274 = arith.mulf %269, %273 : vector<1x256xf32>
    %cst_78 = arith.constant 1.250000e-01 : f32
    %275 = vector.broadcast %cst_78 : f32 to vector<1x256xf32>
    %276 = arith.mulf %272, %275 : vector<1x256xf32>
    %277 = arith.mulf %274, %274 : vector<1x256xf32>
    %278 = arith.subf %276, %277 : vector<1x256xf32>
    %cst_79 = arith.constant 0.000000e+00 : f32
    %279 = vector.broadcast %cst_79 : f32 to vector<1x256xf32>
    %280 = arith.maximumf %278, %279 : vector<1x256xf32>
    %cst_80 = arith.constant 9.99999974E-6 : f32
    %281 = vector.broadcast %cst_80 : f32 to vector<1x256xf32>
    %282 = arith.addf %280, %281 : vector<1x256xf32>
    %283 = math.rsqrt %282 : vector<1x256xf32>
    %284 = arith.mulf %266, %283 : vector<1x256xf32>
    %285 = arith.mulf %274, %284 : vector<1x256xf32>
    %286 = arith.subf %267, %285 : vector<1x256xf32>
    %287 = vector.broadcast %284 : vector<1x256xf32> to vector<8x256xf32>
    %288 = arith.mulf %265, %287 : vector<8x256xf32>
    %289 = vector.broadcast %286 : vector<1x256xf32> to vector<8x256xf32>
    %290 = arith.addf %288, %289 : vector<8x256xf32>
    %cst_81 = arith.constant 0.000000e+00 : f32
    %291 = vector.broadcast %cst_81 : f32 to vector<8x256xf32>
    %292 = arith.maximumf %290, %291 : vector<8x256xf32>
    %293 = arith.truncf %292 : vector<8x256xf32> to vector<8x256xbf16>
    %c448 = arith.constant 448 : index
    %c0_82 = arith.constant 0 : index
    %294 = vector.load %arg1[%c448, %c0_82] : memref<704x256xbf16, #tpu.memory_space<vmem>>, vector<256x128xbf16>
    %cst_83 = arith.constant dense<0.000000e+00> : vector<8x128xf32>
    %295 = tpu.matmul %293, %294, %cst_83 {dimension_numbers = #tpu.dot_dimension_numbers<[1], [0], [0], [1], [0, 0, 1, 1], [], []>} : vector<8x256xbf16>, vector<256x128xbf16>, vector<8x128xf32> -> vector<8x128xf32>
    %c17 = arith.constant 17 : index
    %c0_84 = arith.constant 0 : index
    %296 = vector.load %arg2[%c17, %c0_84] : memref<18x256xf32, #tpu.memory_space<vmem>>, vector<1x128xf32>
    %297 = vector.broadcast %296 : vector<1x128xf32> to vector<8x128xf32>
    %298 = arith.addf %295, %297 : vector<8x128xf32>
    %c0_85 = arith.constant 0 : index
    %c0_86 = arith.constant 0 : index
    %299 = vector.load %arg3[%c0_85, %c0_86] : memref<8x128xf32, #tpu.memory_space<vmem>>, vector<8x128xf32>
    tpu.vector_store %arg3[%c0_85, %c0_86], %298 {strides = array<i32>} : memref<8x128xf32, #tpu.memory_space<vmem>>, vector<8x128xf32>,
    return
  }
}

</mosaic_0001>

<bundles_post_ra>
// kernel: rnn_forward.1
= control target key start
LH: loop header
LB: loop body
LE: loop exit
PB: predicated region body
PF: predicated region fallthrough
CT: control target
= control target key end

     0   :  { %8 = vsyncpa [#allocation3], 0  ;;  %s2006_s0 = inlined_call_operand.vmem [shape: f32[3,8,3], index: 0, kind: input, shape index: {}]   ;;  %s2007_s1 = inlined_call_operand.hbm [shape: bf16[704,256], index: 1, kind: input, shape index: {}]   ;;  %s2008_s2 = inlined_call_operand.hbm [shape: f32[18,256], index: 2, kind: input, shape index: {}]   ;;  %s2009_s3 = inlined_call_operand.vmem [shape: f32[8,128], index: 3, kind: output, shape index: {}]  }
   0x1   :  { %9 = vsyncpa [#allocation5], 0  ;;  %s1724_s12 = smov [#allocation2]   ;;  %s1676_s16 = scalar_lea.hbm %s2007_s1, 11264 }
   0x2   :  { %s17_s13 = sshll.u32 %s1724_s12, 4  ;;  %p1677_p0 = scmp.ne.s32.totalorder %s2007_s1, %s1676_s16  ;;  %s18_s13 = int_to_ptr.vmem [resolvable:$true] %s17_s13 }
   0x3   :  { %p1680_p1 = scmp.lt.u32.totalorder %s1676_s16, %s2007_s1 }
   0x5   :  { %p1682_p2 = pnand %p1680_p1, %p1677_p0 }
   0x7   :  { %1685 = shalt.err (!%p1682_p2)
}
   0x8   :  { %s1686_s21 = scalar_lea.vmem %s18_s13, 11264  ;;  %p1691_p4 = scmp.lt.s32.totalorder %s18_s13, %s18_s13 }
   0x9   :  { %p1687_p3 = scmp.ne.s32.totalorder %s18_s13, %s1686_s21  ;;  %p1692_p5 = scmp.lt.s32.totalorder %s1686_s21, %s1686_s21 }
   0xb   :  { %p1693_p6 = por %p1692_p5, %p1691_p4 }
   0xd   :  { %p1694_p7 = pnand %p1693_p6, %p1687_p3 }
   0xf   :  { %1697 = shalt.err (!%p1694_p7)
}
  0x10   :  { %s1725_s22 = smov 128   ;;  %s1726_s23 = smov 8  }
  0x11   :  { %23 = dma.hbm_to_vmem [thread:$0]  %s2007_s1, 11264, %s18_s13, [#allocation3], %s1725_s22, %s1725_s22, %s1726_s23  }
  0x12   :  { %s1727_s26 = smov [#allocation4]   ;;  %s1698_s30 = scalar_lea.hbm %s2008_s2, 768 }
  0x13   :  { %s29_s27 = sshll.u32 %s1727_s26, 4  ;;  %p1699_p8 = scmp.ne.s32.totalorder %s2008_s2, %s1698_s30  ;;  %s30_s27 = int_to_ptr.vmem [resolvable:$true] %s29_s27 }
  0x14   :  { %p1702_p9 = scmp.lt.u32.totalorder %s1698_s30, %s2008_s2 }
  0x16   :  { %p1704_p10 = pnand %p1702_p9, %p1699_p8 }
  0x18   :  { %1707 = shalt.err (!%p1704_p10)
}
  0x19   :  { %s1708_s8 = scalar_lea.vmem %s30_s27, 768  ;;  %p1713_p12 = scmp.lt.s32.totalorder %s30_s27, %s30_s27 }
  0x1a   :  { %p1709_p11 = scmp.ne.s32.totalorder %s30_s27, %s1708_s8  ;;  %p1714_p13 = scmp.lt.s32.totalorder %s1708_s8, %s1708_s8 }
  0x1c   :  { %p1715_p0 = por %p1714_p13, %p1713_p12 }
  0x1e   :  { %p1716_p1 = pnand %p1715_p0, %p1709_p11 }
  0x20   :  { %1719 = shalt.err (!%p1716_p1)
}
  0x21   :  { %s1728_s1 = smov 256   ;;  %s1729_s9 = smov 16  }
  0x22   :  { %35 = dma.hbm_to_vmem [thread:$0]  %s2008_s2, 768, %s30_s27, [#allocation5], %s1728_s1, %s1728_s1, %s1729_s9  }
  0x23   :  { %1720 = dma.done.wait [#allocation3], 11264  }
  0x24   :  { %1721 = vsyncadd [#allocation3], 4294956032 }
  0x25   :  { %1722 = dma.done.wait [#allocation5], 768  }
  0x26   :  { %1723 = vsyncadd [#allocation5], 4294966528  ;;  %v1730_v0 = vmov 0   ;;  %v1731_v1 = vmov 2   ;;  %v1784_v2 = vld [vmem:[#allocation2 + $0x4] ss:$8 sps:$4 sm:$0xff]   ;;  %v70_v12 = vlaneseq }
  0x27   :  { %201 = vmatprep.mubr.bf16.mxu0 %v1730_v0  ;;  %1570 = vset.pattern.permute.xlu0 %v1730_v0  ;;  %v1786_v3 = vld [vmem:[#allocation2] ss:$8 sps:$4 sm:$0xff]   ;;  %v1789_v4 = vld [vmem:[#allocation2 + $0x14] ss:$8 sps:$4 sm:$0xff]   ;;  %v1792_v5 = vld [vmem:[#allocation2 + $0x10] ss:$8 sps:$4 sm:$0xff]  }
  0x28   :  { %1572 = vset.pattern.permute.xlu1 %v1731_v1  ;;  %169 = vmatprep.subr.bf16.mxu0 %v1784_v2  ;;  %v1795_v6 = vld [vmem:[#allocation2 + $0x24] ss:$8 sps:$4 sm:$0xff]   ;;  %v1797_v7 = vld [vmem:[#allocation2 + $0x20] ss:$8 sps:$4 sm:$0xff]   ;;  %v1802_v9 = vld [vmem:[#allocation2 + $0x34] ss:$8 sps:$4 sm:$0xff]  }
  0x29   :  { %170 = vmatpush1.bf16.msra.mxu0 %v1786_v3  ;;  %v64_v8 = vld [vmem:[%s2006_s0] sm:$0xff]  ;;  %v1806_v10 = vld [vmem:[#allocation2 + $0x30] ss:$8 sps:$4 sm:$0xff]   ;;  %v1732_v11 = vmov 1   ;;  %v1822_v13 = vshrl.u32 %v70_v12, 7  ;;  %s1733_s13 = smov 64  }
  0x2a   :  { %171 = vmatprep.subr.bf16.mxu0 %v1789_v4  ;;  %67 = vperm.xlu0 %1570, %v64_v8   ;;  %v59_v17 = vld [vmem:[#allocation4] sm:$0x7]  ;;  %v60_v18 = vld [vmem:[#allocation4 + $0x8] sm:$0x7]  ;;  %v1734_v57 = vmov 0.0   ;;  %vm1735_vm0 = vmmov 0  }
  0x2b   :  { %97 = vperm.xlu1 %1572, %v64_v8   ;;  %v1825_v15 = vsub.s32 0, %v1822_v13  ;;  %v1828_v16 = vsub.s32 1, %v1822_v13  ;;  %v102_v21 = vsub.s32 2, %v1822_v13  ;;  %v62_v36 = vld [vmem:[#allocation4 + $0x3] ss:$8 sm:$0x3]  ;;  %1485 = vmatprep.subr.bf16.mxu1 %v1734_v57 }
  0x2c   :  { %v1380_v55 = vld [vmem:[%s2006_s0 + $0x8] sm:$0xff]  ;;  %v1871_v58 = vld [vmem:[#allocation2 + $0x50] ss:$8 sps:$4 sm:$0xff]   ;;  %1493 = vmatprep.mubr.msk.bf16.mxu1 %vm1735_vm0, %v1734_v57  ;;  %vm165_vm1 = vcmask 523264  }
  0x2d   :  { %172 = vmatpush1.bf16.msra.mxu0 %v1792_v5  ;;  %v1831_v19 = vrot.slane %v59_v17, %v1825_v15  ;;  %v1834_v20 = vrot.slane %v59_v17, %v1828_v16  ;;  %v1838_v22 = vrot.slane %v60_v18, %v1825_v15  ;;  %v1841_v24 = vrot.slane %v60_v18, %v1828_v16  ;;  %v1866_v56 = vld [vmem:[#allocation2 + $0x40] ss:$8 sps:$4 sm:$0xff]   ;;  %v1882_v62 = vld [vmem:[#allocation2 + $0x70] ss:$8 sps:$4 sm:$0xff]  }
  0x2e   :  { %173 = vmatprep.subr.bf16.mxu0 %v1795_v6  ;;  %1571 = vset.pattern.permute.xlu0 %v1732_v11  ;;  %v1845_v27 = vrot.slane %v59_v17, %v102_v21  ;;  %v1849_v31 = vrot.slane %v60_v18, %v102_v21  ;;  %v1854_v38 = vrot.slane %v62_v36, %v1825_v15  ;;  %v1876_v59 = vld [vmem:[#allocation2 + $0x60] ss:$8 sps:$4 sm:$0xff]  }
  0x2f   :  { %1573 = vset.pattern.permute.xlu1 %v1730_v0  ;;  %81 = vperm.xlu0 %1571, %v64_v8   ;;  %v1857_v40 = vrot.slane %v62_v36, %v1828_v16 }
  0x30   :  { %1486 = vmatpush3.bf16.msra.mxu1 %v1866_v56 }
  0x31   :  { %174 = vmatpush1.bf16.msra.mxu0 %v1797_v7  ;;  %1487 = vmatprep.subr.bf16.mxu1 %v1734_v57 }
  0x32   :  { %175 = vmatprep.subr.bf16.mxu0 %v1802_v9 }
  0x34   :  { %1488 = vmatpush3.bf16.msra.mxu1 %v1871_v58 }
  0x35   :  { %176 = vmatpush1.bf16.msra.mxu0 %v1806_v10  ;;  %1489 = vmatprep.subr.bf16.mxu1 %v1734_v57 }
  0x36   :  { %369 = vmatprep.subr.bf16.mxu0 %v1784_v2 }
  0x38   :  { %202 = vmatmul.mubr.bf16.vlgmr.msra.gmra.mrb[0].mxu0 %v1730_v0  ;;  %1490 = vmatpush3.bf16.msra.mxu1 %v1876_v59 }
  0x39   :  { %370 = vmatpush1.bf16.msra.mxu0 %v1786_v3  ;;  %401 = vmatprep.mubr.bf16.mxu0 %v1730_v0 }
  0x3a   :  { %371 = vmatprep.subr.bf16.mxu0 %v1789_v4  ;;  %1491 = vmatprep.subr.bf16.mxu1 %v1734_v57 }
  0x3c   :  { %1492 = vmatpush3.bf16.msra.mxu1 %v1882_v62 }
  0x3d   :  { %372 = vmatpush1.bf16.msra.mxu0 %v1792_v5  ;;  %1497 = vmatprep.subr.bf16.mxu1 %v1734_v57 }
  0x3e   :  { %373 = vmatprep.subr.bf16.mxu0 %v1795_v6 }
  0x41   :  { %374 = vmatpush1.bf16.msra.mxu0 %v1797_v7 }
  0x42   :  { %375 = vmatprep.subr.bf16.mxu0 %v1802_v9 }
  0x45   :  { %376 = vmatpush1.bf16.msra.mxu0 %v1806_v10 }
  0x46   :  { %1509 = vmatprep.subr.bf16.mxu0 %v1734_v57 }
  0xa9   :  { %v68_v14 = vpop.permute.xlu0 %67 }
  0xaa   :  { %v78_v25 = vmul.f32 %v1831_v19, %v68_v14  ;;  %v79_v28 = vmul.f32 %v1838_v22, %v68_v14  ;;  %v98_v30 = vpop.permute.xlu1 %97 }
  0xab   :  { %v108_v33 = vmul.f32 %v1845_v27, %v98_v30  ;;  %v109_v35 = vmul.f32 %v1849_v31, %v98_v30 }
  0xae   :  { %v82_v23 = vpop.permute.xlu0 %81 }
  0xaf   :  { %v92_v26 = vmul.f32 %v1834_v20, %v82_v23  ;;  %v93_v29 = vmul.f32 %v1841_v24, %v82_v23 }
  0xb1   :  { %v94_v32 = vadd.f32 %v92_v26, %v78_v25  ;;  %v95_v34 = vadd.f32 %v93_v29, %v79_v28 }
  0xb3   :  { %v110_v37 = vadd.f32 %v108_v33, %v94_v32  ;;  %v111_v39 = vadd.f32 %v109_v35, %v95_v34 }
  0xb5   :  { %v123_v41 = vadd.f32 %v1854_v38, %v110_v37  ;;  %v124_v43 = vadd.f32 %v1857_v40, %v111_v39 }
 0x10b   :  { %v203_v42 = vpop.f32.mrb[0].mxu0 }
 0x10c   :  { %v210_v44 = vadd.f32 %v203_v42, %v123_v41  ;;  %v205_v45 = vpop.f32.mrb[1].mxu0 }
 0x10d   :  { %v211_v46 = vadd.f32 %v205_v45, %v124_v43  ;;  %v207_v47 = vpop.f32.mrb[2].mxu0 }
 0x10e   :  { %v208_v48 = vpop.f32.mrb[3].mxu0 }
 0x10f   :  { %1646 = vtanh.f32 %v211_v46 }
 0x110   :  { %1648 = vtanh.f32 %v210_v44 }
 0x119   :  { %v1647_v49 = vpop.eup %1646 }
 0x11a   :  { %220 = vrot.lane.b32.xlu1 %v1647_v49, %s1733_s13  ;;  %v1649_v50 = vpop.eup %1648  ;;  %v215_v11 = vmul.f32 0.5, %v1647_v49 }
 0x11b   :  { %v214_v51 = vmul.f32 0.5, %v1649_v50 }
 0x11c   :  { %v217_v12 = vadd.f32 0.5, %v215_v11 }
 0x11d   :  { %v216_v52 = vadd.f32 0.5, %v214_v51 }
 0x11f   :  { %v218_v60 = vmul.f32 0.0, %v216_v52 }
 0x18c   :  { %v221_v53 = vpop.permute.xlu1 %220 }
 0x18d   :  { %v223_v54 = vmul.f32 %v221_v53, %v216_v52 }
 0x18f   :  { %225 = vrot.lane.b32.xlu1 %v223_v54, %s1733_s13 }
 0x193   :  { %346 = vperm.xlu1 %1573, %v1380_v55  }
 0x197   :  { %1574 = vset.pattern.permute.xlu1 %v1731_v1 }
 0x198   :  { %360 = vperm.xlu1 %1574, %v1380_v55  }
 0x19c   :  { %1575 = vset.pattern.permute.xlu1 %v1730_v0 }
 0x201   :  { %v226_v61 = vpop.permute.xlu1 %225 }
 0x202   :  { %v1884_v63 = vadd.f32 %v226_v61, %v218_v60 }
 0x204   :  { %1650 = vtanh.f32 %v1884_v63 }
 0x20e   :  { %v1651_v8 = vpop.eup %1650 }
 0x20f   :  { %231 = vrot.lane.b32.xlu0 %v1651_v8, %s1733_s13  ;;  %v1393_v8 = vld [vmem:[%s2006_s0 + $0x10] sm:$0xff] }
 0x212   :  { %v347_v21 = vpop.permute.xlu1 %346 }
 0x213   :  { %352 = vperm.xlu0 %1571, %v1380_v55   ;;  %v349_v25 = vmul.f32 %v347_v21, %v1831_v19  ;;  %v350_v28 = vmul.f32 %v347_v21, %v1838_v22 }
 0x217   :  { %v361_v30 = vpop.permute.xlu1 %360 }
 0x218   :  { %v363_v33 = vmul.f32 %v361_v30, %v1845_v27  ;;  %v364_v35 = vmul.f32 %v361_v30, %v1849_v31 }
 0x281   :  { %v232_v14 = vpop.permute.xlu0 %231 }
 0x282   :  { %v234_v17 = vmul.f32 %v232_v14, %v217_v12 }
 0x284   :  { %v235_v18 = vpack.c.bf16 %v234_v17, %v234_v17 }
 0x286   :  { %1494 = vmatmul.mubr.msk.bf16.vlgmr.msra.gmra.mrb[0].mxu1 %vm165_vm1, %v235_v18  ;;  %1381 = vmatmul.mubr.msk.bf16.vlgmr.msra.gmra.mrb[4].mxu0 %vm165_vm1, %v235_v18  ;;  %v1926_v18 = vld [vmem:[#allocation4 + $0x7] ss:$0 sm:$0xff] }
 0x287   :  { %1498 = vmatpush3.bf16.msra.mxu1 %v1866_v56  ;;  %1505 = vmatprep.mubr.msk.bf16.mxu1 %vm1735_vm0, %v1734_v57 }
 0x288   :  { %1499 = vmatprep.subr.bf16.mxu1 %v1734_v57  ;;  %1517 = vmatprep.mubr.msk.bf16.mxu0 %vm1735_vm0, %v1734_v57 }
 0x28b   :  { %1500 = vmatpush3.bf16.msra.mxu1 %v1871_v58 }
 0x28c   :  { %1501 = vmatprep.subr.bf16.mxu1 %v1734_v57 }
 0x28f   :  { %1502 = vmatpush3.bf16.msra.mxu1 %v1876_v59 }
 0x290   :  { %1503 = vmatprep.subr.bf16.mxu1 %v1734_v57 }
 0x292   :  { %v353_v23 = vpop.permute.xlu0 %352 }
 0x293   :  { %1504 = vmatpush3.bf16.msra.mxu1 %v1882_v62  ;;  %v355_v26 = vmul.f32 %v353_v23, %v1834_v20  ;;  %v356_v29 = vmul.f32 %v353_v23, %v1841_v24 }
 0x294   :  { %1521 = vmatprep.subr.bf16.mxu1 %v1734_v57 }
 0x295   :  { %v357_v32 = vadd.f32 %v355_v26, %v349_v25  ;;  %v358_v34 = vadd.f32 %v356_v29, %v350_v28 }
 0x297   :  { %v365_v36 = vadd.f32 %v363_v33, %v357_v32  ;;  %v366_v37 = vadd.f32 %v364_v35, %v358_v34 }
 0x299   :  { %v367_v39 = vadd.f32 %v365_v36, %v1854_v38  ;;  %v368_v43 = vadd.f32 %v366_v37, %v1857_v40 }
 0x359   :  { %v297_v41 = vpop.f32.mrb[0].mxu1  ;;  %v403_v42 = vpop.f32.mrb[4].mxu0 }
 0x35a   :  { %v410_v44 = vadd.f32 %v403_v42, %v367_v39  ;;  %v1495_v45 = vpop.f32.mrb[1].mxu1  ;;  %v405_v46 = vpop.f32.mrb[5].mxu0  ;;  %v298_v21 = vadd.f32 %v297_v41, %v1926_v18 }
 0x35b   :  { %v411_v47 = vadd.f32 %v405_v46, %v368_v43  ;;  %v300_v48 = vpop.f32.mrb[2].mxu1  ;;  %v407_v49 = vpop.f32.mrb[6].mxu0 }
 0x35c   :  { %v1496_v50 = vpop.f32.mrb[3].mxu1  ;;  %v408_v51 = vpop.f32.mrb[7].mxu0  ;;  %v305_v23 = vsel %vm165_vm1, %v298_v21, 0.0  ;;  %v312_v25 = vmul.f32 %v298_v21, %v298_v21  ;;  %v303_v49 = vld [vmem:[#allocation4 + $0x10] ss:$0 sm:$0xff] }
 0x35d   :  { %1652 = vtanh.f32 %v411_v47  ;;  %v306_v26 = vrot.slane %v305_v23, 4 }
 0x35e   :  { %1654 = vtanh.f32 %v410_v44 }
 0x35f   :  { %v307_v28 = vadd.f32 %v306_v26, %v305_v23 }
 0x361   :  { %v308_v30 = vrot.slane %v307_v28, 2 }
 0x363   :  { %v309_v33 = vadd.f32 %v308_v30, %v307_v28  ;;  %v1600_v28 = vld [vmem:[#allocation2 + $0xe0] ss:$8 sps:$4 sm:$0xff]  }
 0x365   :  { %v310_v35 = vrot.slane %v309_v33, 1 }
 0x367   :  { %v1653_v52 = vpop.eup %1652  ;;  %v311_v37 = vadd.f32 %v310_v35, %v309_v33 }
 0x368   :  { %420 = vrot.lane.b32.xlu0 %v1653_v52, %s1733_s13  ;;  %v1655_v53 = vpop.eup %1654  ;;  %v415_v47 = vmul.f32 0.5, %v1653_v52 }
 0x369   :  { %v414_v54 = vmul.f32 0.5, %v1655_v53  ;;  %v320_v42 = vmul.f32 0.125, %v311_v37 }
 0x36a   :  { %v417_v51 = vadd.f32 0.5, %v415_v47 }
 0x36b   :  { %v416_v55 = vadd.f32 0.5, %v414_v54  ;;  %v322_v41 = vmul.f32 %v320_v42, %v320_v42 }
 0x36d   :  { %v418_v11 = vmul.f32 %v416_v55, %v1884_v63  ;;  %v313_v63 = vsel %vm165_vm1, %v312_v25, 0.0  ;;  %v1597_v25 = vld [vmem:[#allocation2 + $0xb0] ss:$8 sps:$4 sm:$0xff]  }
 0x36e   :  { %v314_v29 = vrot.slane %v313_v63, 4 }
 0x370   :  { %v315_v32 = vadd.f32 %v314_v29, %v313_v63 }
 0x372   :  { %v316_v34 = vrot.slane %v315_v32, 2 }
 0x374   :  { %v317_v36 = vadd.f32 %v316_v34, %v315_v32 }
 0x3da   :  { %v421_v60 = vpop.permute.xlu0 %420 }
 0x3db   :  { %v423_v61 = vmul.f32 %v421_v60, %v416_v55  ;;  %v1594_v55 = vld [vmem:[#allocation2 + $0x80] ss:$8 sps:$4 sm:$0xff]  }
 0x3dd   :  { %425 = vrot.lane.b32.xlu1 %v423_v61, %s1733_s13 }
 0x3e1   :  { %656 = vperm.xlu1 %1575, %v1393_v8  }
 0x3e5   :  { %1576 = vset.pattern.permute.xlu1 %v1731_v1 }
 0x3e6   :  { %670 = vperm.xlu1 %1576, %v1393_v8  }
 0x44f   :  { %v426_v12 = vpop.permute.xlu1 %425 }
 0x450   :  { %v1921_v14 = vadd.f32 %v426_v12, %v418_v11  ;;  %v1595_v11 = vld [vmem:[#allocation2 + $0x90] ss:$8 sps:$4 sm:$0xff]  }
 0x452   :  { %1656 = vtanh.f32 %v1921_v14 }
 0x45c   :  { %v1657_v17 = vpop.eup %1656 }
 0x45d   :  { %431 = vrot.lane.b32.xlu0 %v1657_v17, %s1733_s13  ;;  %v1596_v17 = vld [vmem:[#allocation2 + $0xa0] ss:$8 sps:$4 sm:$0xff]  }
 0x461   :  { %662 = vperm.xlu0 %1571, %v1393_v8   ;;  %v304_v8 = vld [vmem:[#allocation4 + $0x13] ss:$0 sm:$0xff] }
 0x465   :  { %1577 = vset.pattern.permute.xlu0 %v1731_v1  ;;  %v318_v1 = vrot.slane %v317_v36, 1 }
 0x467   :  { %v319_v39 = vadd.f32 %v318_v1, %v317_v36 }
 0x469   :  { %v321_v43 = vmul.f32 0.125, %v319_v39 }
 0x46b   :  { %v323_v44 = vsub.f32 %v321_v43, %v322_v41 }
 0x46d   :  { %v324_v45 = vmax.f32 %v323_v44, 0.0 }
 0x46f   :  { %v325_v46 = vadd.f32 1e-05, %v324_v45 }
 0x471   :  { %1658 = vrsqrt.f32 %v325_v46 }
 0x47b   :  { %v1659_v48 = vpop.eup %1658 }
 0x47c   :  { %v327_v50 = vmul.f32 %v1659_v48, %v303_v49 }
 0x47e   :  { %v328_v60 = vmul.f32 %v327_v50, %v320_v42  ;;  %v330_v12 = vmul.f32 %v327_v50, %v298_v21  ;;  %v1598_v21 = vld [vmem:[#allocation2 + $0xc0] ss:$8 sps:$4 sm:$0xff]  }
 0x47f   :  { %1510 = vmatpush3.bf16.msra.mxu0 %v1598_v21 }
 0x480   :  { %v329_v52 = vsub.f32 %v304_v8, %v328_v60  ;;  %1511 = vmatprep.subr.bf16.mxu0 %v1734_v57 }
 0x482   :  { %v331_v23 = vadd.f32 %v330_v12, %v329_v52  ;;  %v479_v52 = vld [vmem:[#allocation4 + $0x11] ss:$0 sm:$0xff] }
 0x484   :  { %v332_v26 = vmax.f32 %v331_v23, 0.0  ;;  %v480_v23 = vld [vmem:[#allocation4 + $0x14] ss:$0 sm:$0xff] }
 0x486   :  { %v333_v63 = vpack.c.bf16 %v332_v26, %v332_v26 }
 0x4cf   :  { %v432_v53 = vpop.permute.xlu0 %431 }
 0x4d0   :  { %v434_v54 = vmul.f32 %v432_v53, %v417_v51 }
 0x4d2   :  { %v1931_v61 = vpack.c.bf16 %v434_v54, %v434_v54 }
 0x4d4   :  { %1506 = vmatmul.mubr.msk.bf16.vlgmr.msra.gmra.mrb[4].mxu1 %vm165_vm1, %v1931_v61 }
 0x4d5   :  { %1522 = vmatpush3.bf16.msra.mxu1 %v1594_v55  ;;  %1529 = vmatprep.mubr.msk.bf16.mxu1 %vm1735_vm0, %v1734_v57 }
 0x4d6   :  { %1523 = vmatprep.subr.bf16.mxu1 %v1734_v57 }
 0x4d9   :  { %1524 = vmatpush3.bf16.msra.mxu1 %v1595_v11 }
 0x4da   :  { %1525 = vmatprep.subr.bf16.mxu1 %v1734_v57 }
 0x4dd   :  { %1526 = vmatpush3.bf16.msra.mxu1 %v1596_v17 }
 0x4de   :  { %1527 = vmatprep.subr.bf16.mxu1 %v1734_v57 }
 0x4e1   :  { %1528 = vmatpush3.bf16.msra.mxu1 %v1597_v25 }
 0x4e2   :  { %1533 = vmatprep.subr.bf16.mxu1 %v1734_v57 }
 0x4e4   :  { %1530 = vmatmul.mubr.msk.bf16.vlgmr.msra.gmra.mrb[8].mxu1 %vm165_vm1, %v333_v63 }
 0x4e5   :  { %1534 = vmatpush3.bf16.msra.mxu1 %v1866_v56  ;;  %1541 = vmatprep.mubr.msk.bf16.mxu1 %vm1735_vm0, %v1734_v57  ;;  %v1599_v56 = vld [vmem:[#allocation2 + $0xd0] ss:$8 sps:$4 sm:$0xff]  }
 0x4e6   :  { %1535 = vmatprep.subr.bf16.mxu1 %v1734_v57  ;;  %1512 = vmatpush3.bf16.msra.mxu0 %v1599_v56 }
 0x4e7   :  { %1513 = vmatprep.subr.bf16.mxu0 %v1734_v57 }
 0x4e9   :  { %1536 = vmatpush3.bf16.msra.mxu1 %v1871_v58  ;;  %v1601_v58 = vld [vmem:[#allocation2 + $0xf0] ss:$8 sps:$4 sm:$0xff]  }
 0x4ea   :  { %1537 = vmatprep.subr.bf16.mxu1 %v1734_v57  ;;  %1514 = vmatpush3.bf16.msra.mxu0 %v1600_v28 }
 0x4eb   :  { %1515 = vmatprep.subr.bf16.mxu0 %v1734_v57 }
 0x4ed   :  { %1538 = vmatpush3.bf16.msra.mxu1 %v1876_v59 }
 0x4ee   :  { %1539 = vmatprep.subr.bf16.mxu1 %v1734_v57  ;;  %1516 = vmatpush3.bf16.msra.mxu0 %v1601_v58 }
 0x4ef   :  { %679 = vmatprep.subr.bf16.mxu0 %v1784_v2 }
 0x4f1   :  { %1540 = vmatpush3.bf16.msra.mxu1 %v1882_v62 }
 0x5a7   :  { %v473_v59 = vpop.f32.mrb[4].mxu1 }
 0x5a8   :  { %v474_v29 = vadd.f32 %v473_v59, %v1926_v18  ;;  %v1507_v62 = vpop.f32.mrb[5].mxu1 }
 0x5a9   :  { %v476_v30 = vpop.f32.mrb[6].mxu1 }
 0x5aa   :  { %v481_v32 = vsel %vm165_vm1, %v474_v29, 0.0  ;;  %v488_v33 = vmul.f32 %v474_v29, %v474_v29  ;;  %v1508_v34 = vpop.f32.mrb[7].mxu1 }
 0x5ab   :  { %v482_v35 = vrot.slane %v481_v32, 4 }
 0x5ac   :  { %v489_v36 = vsel %vm165_vm1, %v488_v33, 0.0 }
 0x5ad   :  { %v483_v37 = vadd.f32 %v482_v35, %v481_v32  ;;  %v490_v1 = vrot.slane %v489_v36, 4 }
 0x5af   :  { %v484_v39 = vrot.slane %v483_v37, 2  ;;  %v491_v42 = vadd.f32 %v490_v1, %v489_v36 }
 0x5b1   :  { %v485_v43 = vadd.f32 %v484_v39, %v483_v37  ;;  %v492_v41 = vrot.slane %v491_v42, 2 }
 0x5b3   :  { %v486_v44 = vrot.slane %v485_v43, 1  ;;  %v493_v2 = vadd.f32 %v492_v41, %v491_v42 }
 0x5b5   :  { %v487_v45 = vadd.f32 %v486_v44, %v485_v43  ;;  %v494_v46 = vrot.slane %v493_v2, 1 }
 0x5b7   :  { %v495_v47 = vadd.f32 %v494_v46, %v493_v2  ;;  %v496_v48 = vmul.f32 0.125, %v487_v45  ;;  %v646_v49 = vpop.f32.mrb[8].mxu1 }
 0x5b8   :  { %v1531_v50 = vpop.f32.mrb[9].mxu1 }
 0x5b9   :  { %v497_v51 = vmul.f32 0.125, %v495_v47  ;;  %v498_v53 = vmul.f32 %v496_v48, %v496_v48  ;;  %v649_v54 = vpop.f32.mrb[10].mxu1 }
 0x5ba   :  { %v1532_v55 = vpop.f32.mrb[11].mxu1  ;;  %v1604_v54 = vld [vmem:[#allocation2 + $0x120] ss:$8 sps:$4 sm:$0xff]  }
 0x5bb   :  { %v499_v60 = vsub.f32 %v497_v51, %v498_v53  ;;  %v1602_v53 = vld [vmem:[#allocation2 + $0x100] ss:$8 sps:$4 sm:$0xff]   ;;  %v1605_v55 = vld [vmem:[#allocation2 + $0x130] ss:$8 sps:$4 sm:$0xff]  }
 0x5bd   :  { %v500_v8 = vmax.f32 %v499_v60, 0.0 }
 0x5bf   :  { %v501_v11 = vadd.f32 1e-05, %v500_v8 }
 0x5c1   :  { %1660 = vrsqrt.f32 %v501_v11 }
 0x5cb   :  { %v1661_v12 = vpop.eup %1660 }
 0x5cc   :  { %v503_v17 = vmul.f32 %v1661_v12, %v479_v52 }
 0x5ce   :  { %v504_v25 = vmul.f32 %v503_v17, %v496_v48  ;;  %v506_v63 = vmul.f32 %v503_v17, %v474_v29 }
 0x5d0   :  { %v505_v26 = vsub.f32 %v480_v23, %v504_v25 }
 0x5d2   :  { %v507_v21 = vadd.f32 %v506_v63, %v505_v26 }
 0x5d4   :  { %v508_v56 = vmax.f32 %v507_v21, 0.0 }
 0x5d6   :  { %v509_v28 = vpack.c.bf16 %v508_v56, %v508_v56 }
 0x5d8   :  { %1518 = vmatmul.mubr.msk.bf16.vlgmr.msra.gmra.mrb[8].mxu0 %vm165_vm1, %v509_v28 }
 0x5d9   :  { %680 = vmatpush1.bf16.msra.mxu0 %v1786_v3  ;;  %711 = vmatprep.mubr.bf16.mxu0 %v1730_v0  ;;  %v657_v3 = vpop.permute.xlu1 %656 }
 0x5da   :  { %681 = vmatprep.subr.bf16.mxu0 %v1789_v4  ;;  %v663_v4 = vpop.permute.xlu0 %662  ;;  %v660_v29 = vmul.f32 %v657_v3, %v1838_v22 }
 0x5db   :  { %v666_v62 = vmul.f32 %v663_v4, %v1841_v24 }
 0x5dd   :  { %682 = vmatpush1.bf16.msra.mxu0 %v1792_v5  ;;  %v668_v33 = vadd.f32 %v666_v62, %v660_v29 }
 0x5de   :  { %683 = vmatprep.subr.bf16.mxu0 %v1795_v6 }
 0x5e1   :  { %684 = vmatpush1.bf16.msra.mxu0 %v1797_v7  ;;  %v659_v7 = vmul.f32 %v657_v3, %v1831_v19 }
 0x5e2   :  { %685 = vmatprep.subr.bf16.mxu0 %v1802_v9  ;;  %v665_v9 = vmul.f32 %v663_v4, %v1834_v20 }
 0x5e4   :  { %v667_v30 = vadd.f32 %v665_v9, %v659_v7 }
 0x5e5   :  { %686 = vmatpush1.bf16.msra.mxu0 %v1806_v10 }
 0x5e6   :  { %1545 = vmatprep.subr.bf16.mxu0 %v1734_v57 }
 0x5e8   :  { %1394 = vmatmul.mubr.msk.bf16.vlgmr.msra.gmra.mrb[12].mxu0 %vm165_vm1, %v1931_v61  ;;  %v671_v61 = vpop.permute.xlu1 %670 }
 0x5e9   :  { %1553 = vmatprep.mubr.msk.bf16.mxu0 %vm1735_vm0, %v1734_v57  ;;  %v673_v32 = vmul.f32 %v671_v61, %v1845_v27  ;;  %v674_v34 = vmul.f32 %v671_v61, %v1849_v31  ;;  %1546 = vmatpush3.bf16.msra.mxu0 %v1602_v53  ;;  %v789_v61 = vld [vmem:[#allocation4 + $0x12] ss:$0 sm:$0xff] }
 0x5ea   :  { %1547 = vmatprep.subr.bf16.mxu0 %v1734_v57 }
 0x5eb   :  { %v675_v35 = vadd.f32 %v673_v32, %v667_v30  ;;  %v676_v36 = vadd.f32 %v674_v34, %v668_v33  ;;  %v790_v33 = vld [vmem:[#allocation4 + $0x15] ss:$0 sm:$0xff] }
 0x5ed   :  { %v677_v37 = vadd.f32 %v675_v35, %v1854_v38  ;;  %v678_v19 = vadd.f32 %v676_v36, %v1857_v40 }
 0x6ab   :  { %v579_v58 = vpop.f32.mrb[8].mxu0 }
 0x6ac   :  { %v1972_v5 = vadd.f32 %v646_v49, %v579_v58  ;;  %v1519_v6 = vpop.f32.mrb[9].mxu0 }
 0x6ad   :  { %v582_v59 = vpop.f32.mrb[10].mxu0 }
 0x6ae   :  { %v1520_v10 = vpop.f32.mrb[11].mxu0 }
 0x6bb   :  { %v713_v1 = vpop.f32.mrb[12].mxu0 }
 0x6bc   :  { %v720_v20 = vadd.f32 %v713_v1, %v677_v37  ;;  %v715_v39 = vpop.f32.mrb[13].mxu0 }
 0x6bd   :  { %v721_v42 = vadd.f32 %v715_v39, %v678_v19  ;;  %v717_v22 = vpop.f32.mrb[14].mxu0  ;;  %v1606_v39 = vld [vmem:[#allocation2 + $0x140] ss:$8 sps:$4 sm:$0xff]  }
 0x6be   :  { %v718_v43 = vpop.f32.mrb[15].mxu0  ;;  %v1611_v22 = vld [vmem:[#allocation2 + $0x154] ss:$8 sps:$4 sm:$0xff]  }
 0x6bf   :  { %1662 = vtanh.f32 %v721_v42  ;;  %v1609_v42 = vld [vmem:[#allocation2 + $0x150] ss:$8 sps:$4 sm:$0xff]   ;;  %v1614_v43 = vld [vmem:[#allocation2 + $0x164] ss:$8 sps:$4 sm:$0xff]  }
 0x6c0   :  { %1664 = vtanh.f32 %v720_v20  ;;  %v1608_v20 = vld [vmem:[#allocation2 + $0x144] ss:$8 sps:$4 sm:$0xff]  }
 0x6c1   :  { %1036 = vmatprep.subr.bf16.mxu1 %v1608_v20  ;;  %v1639_v20 = vld [vmem:[#allocation2 + $0x200] ss:$8 sps:$4 sm:$0xff]  }
 0x6c9   :  { %v1663_v24 = vpop.eup %1662 }
 0x6ca   :  { %730 = vrot.lane.b32.xlu0 %v1663_v24, %s1733_s13  ;;  %v1665_v27 = vpop.eup %1664  ;;  %v725_v47 = vmul.f32 0.5, %v1663_v24  ;;  %v1612_v24 = vld [vmem:[#allocation2 + $0x160] ss:$8 sps:$4 sm:$0xff]  }
 0x6cb   :  { %v724_v41 = vmul.f32 0.5, %v1665_v27  ;;  %v1617_v27 = vld [vmem:[#allocation2 + $0x174] ss:$8 sps:$4 sm:$0xff]  }
 0x6cc   :  { %v727_v48 = vadd.f32 0.5, %v725_v47  ;;  %v1627_v47 = vld [vmem:[#allocation2 + $0x1b0] ss:$8 sps:$4 sm:$0xff]  }
 0x6cd   :  { %v726_v31 = vadd.f32 0.5, %v724_v41  ;;  %v1615_v41 = vld [vmem:[#allocation2 + $0x170] ss:$8 sps:$4 sm:$0xff]  }
 0x6cf   :  { %v728_v38 = vmul.f32 %v726_v31, %v1921_v14  ;;  %v1603_v14 = vld [vmem:[#allocation2 + $0x110] ss:$8 sps:$4 sm:$0xff]  }
 0x6d0   :  { %1548 = vmatpush3.bf16.msra.mxu0 %v1603_v14 }
 0x6d1   :  { %1549 = vmatprep.subr.bf16.mxu0 %v1734_v57 }
 0x6d4   :  { %1550 = vmatpush3.bf16.msra.mxu0 %v1604_v54 }
 0x6d5   :  { %1551 = vmatprep.subr.bf16.mxu0 %v1734_v57 }
 0x6d8   :  { %1552 = vmatpush3.bf16.msra.mxu0 %v1605_v55 }
 0x73c   :  { %v731_v44 = vpop.permute.xlu0 %730 }
 0x73d   :  { %v733_v2 = vmul.f32 %v731_v44, %v726_v31  ;;  %v1620_v31 = vld [vmem:[#allocation2 + $0x184] ss:$8 sps:$4 sm:$0xff]   ;;  %v1618_v44 = vld [vmem:[#allocation2 + $0x180] ss:$8 sps:$4 sm:$0xff]  }
 0x73f   :  { %735 = vrot.lane.b32.xlu1 %v733_v2, %s1733_s13  ;;  %v1623_v2 = vld [vmem:[#allocation2 + $0x194] ss:$8 sps:$4 sm:$0xff]  }
 0x7b1   :  { %v736_v40 = vpop.permute.xlu1 %735 }
 0x7b2   :  { %v738_v45 = vadd.f32 %v736_v40, %v728_v38  ;;  %v1621_v38 = vld [vmem:[#allocation2 + $0x190] ss:$8 sps:$4 sm:$0xff]   ;;  %v1626_v40 = vld [vmem:[#allocation2 + $0x1a4] ss:$8 sps:$4 sm:$0xff]  }
 0x7b4   :  { %1666 = vtanh.f32 %v738_v45  ;;  %v1624_v45 = vld [vmem:[#allocation2 + $0x1a0] ss:$8 sps:$4 sm:$0xff]  }
 0x7be   :  { %v1667_v46 = vpop.eup %1666 }
 0x7bf   :  { %741 = vrot.lane.b32.xlu0 %v1667_v46, %s1733_s13  ;;  %v1629_v46 = vld [vmem:[#allocation2 + $0x1b4] ss:$8 sps:$4 sm:$0xff]  }
 0x831   :  { %v742_v49 = vpop.permute.xlu0 %741 }
 0x832   :  { %v744_v50 = vmul.f32 %v742_v49, %v727_v48  ;;  %v896_v49 = vld [vmem:[#allocation4 + $0x16] ss:$0 sm:$0xff] }
 0x834   :  { %v745_v51 = vpack.c.bf16 %v744_v50, %v744_v50 }
 0x836   :  { %1542 = vmatmul.mubr.msk.bf16.vlgmr.msra.gmra.mrb[12].mxu1 %vm165_vm1, %v745_v51 }
 0x837   :  { %1068 = vmatprep.mubr.bf16.mxu1 %v1730_v0  ;;  %1037 = vmatpush1.bf16.msra.mxu1 %v1606_v39  ;;  %v1640_v39 = vld [vmem:[#allocation2 + $0x290] ss:$8 sps:$4 sm:$0xff]  }
 0x838   :  { %1038 = vmatprep.subr.bf16.mxu1 %v1611_v22  ;;  %v1642_v22 = vld [vmem:[#allocation2 + $0x2a0] ss:$8 sps:$4 sm:$0xff]  }
 0x83b   :  { %1039 = vmatpush1.bf16.msra.mxu1 %v1609_v42  ;;  %v1641_v42 = vld [vmem:[#allocation2 + $0x210] ss:$8 sps:$4 sm:$0xff]  }
 0x83c   :  { %1040 = vmatprep.subr.bf16.mxu1 %v1614_v43  ;;  %v1643_v43 = vld [vmem:[#allocation2 + $0x220] ss:$8 sps:$4 sm:$0xff]  }
 0x83f   :  { %1041 = vmatpush1.bf16.msra.mxu1 %v1612_v24  ;;  %v1644_v24 = vld [vmem:[#allocation2 + $0x2b0] ss:$8 sps:$4 sm:$0xff]  }
 0x840   :  { %1042 = vmatprep.subr.bf16.mxu1 %v1617_v27  ;;  %v1645_v27 = vld [vmem:[#allocation2 + $0x230] ss:$8 sps:$4 sm:$0xff]  }
 0x843   :  { %1043 = vmatpush1.bf16.msra.mxu1 %v1615_v41  ;;  %v944_v41 = vld [vmem:[#allocation4 + $0x4] ss:$8 sm:$0x3] }
 0x844   :  { %1044 = vmatprep.subr.bf16.mxu1 %v1620_v31  ;;  %v949_v31 = vrot.slane %v944_v41, %v1825_v15 }
 0x847   :  { %1045 = vmatpush1.bf16.msra.mxu1 %v1618_v44  ;;  %v953_v44 = vrot.slane %v944_v41, %v1828_v16 }
 0x848   :  { %1046 = vmatprep.subr.bf16.mxu1 %v1623_v2 }
 0x84b   :  { %1047 = vmatpush1.bf16.msra.mxu1 %v1621_v38 }
 0x84c   :  { %1048 = vmatprep.subr.bf16.mxu1 %v1626_v40 }
 0x84f   :  { %1049 = vmatpush1.bf16.msra.mxu1 %v1624_v45 }
 0x850   :  { %1050 = vmatprep.subr.bf16.mxu1 %v1629_v46 }
 0x853   :  { %1051 = vmatpush1.bf16.msra.mxu1 %v1627_v47 }
 0x909   :  { %v783_v60 = vpop.f32.mrb[12].mxu1 }
 0x90a   :  { %v784_v8 = vadd.f32 %v783_v60, %v1926_v18  ;;  %v1543_v11 = vpop.f32.mrb[13].mxu1 }
 0x90b   :  { %v786_v52 = vpop.f32.mrb[14].mxu1 }
 0x90c   :  { %v791_v0 = vsel %vm165_vm1, %v784_v8, 0.0  ;;  %v798_v12 = vmul.f32 %v784_v8, %v784_v8  ;;  %v1544_v17 = vpop.f32.mrb[15].mxu1 }
 0x90d   :  { %v792_v23 = vrot.slane %v791_v0, 4 }
 0x90e   :  { %v799_v25 = vsel %vm165_vm1, %v798_v12, 0.0 }
 0x90f   :  { %v793_v26 = vadd.f32 %v792_v23, %v791_v0  ;;  %v800_v63 = vrot.slane %v799_v25, 4 }
 0x911   :  { %v794_v21 = vrot.slane %v793_v26, 2  ;;  %v801_v56 = vadd.f32 %v800_v63, %v799_v25 }
 0x913   :  { %v795_v28 = vadd.f32 %v794_v21, %v793_v26  ;;  %v802_v57 = vrot.slane %v801_v56, 2 }
 0x915   :  { %v796_v3 = vrot.slane %v795_v28, 1  ;;  %v803_v4 = vadd.f32 %v802_v57, %v801_v56 }
 0x917   :  { %v797_v58 = vadd.f32 %v796_v3, %v795_v28  ;;  %v804_v6 = vrot.slane %v803_v4, 1 }
 0x919   :  { %v805_v18 = vadd.f32 %v804_v6, %v803_v4  ;;  %v806_v59 = vmul.f32 0.125, %v797_v58  ;;  %v898_v58 = vld [vmem:[#allocation4 + $0x17] ss:$0 sm:$0xff] }
 0x91b   :  { %v807_v7 = vmul.f32 0.125, %v805_v18  ;;  %v808_v9 = vmul.f32 %v806_v59, %v806_v59 }
 0x91d   :  { %v809_v10 = vsub.f32 %v807_v7, %v808_v9 }
 0x91f   :  { %v810_v29 = vmax.f32 %v809_v10, 0.0 }
 0x921   :  { %v811_v62 = vadd.f32 1e-05, %v810_v29 }
 0x923   :  { %1668 = vrsqrt.f32 %v811_v62 }
 0x92d   :  { %v1669_v30 = vpop.eup %1668 }
 0x92e   :  { %v813_v32 = vmul.f32 %v1669_v30, %v789_v61  ;;  %v1630_v30 = vld [vmem:[#allocation2 + $0x240] ss:$8 sps:$4 sm:$0xff]  }
 0x92f   :  { %1463 = vmatprep.subr.bf16.mxu0 %v1630_v30 }
 0x930   :  { %v814_v34 = vmul.f32 %v813_v32, %v806_v59  ;;  %v816_v36 = vmul.f32 %v813_v32, %v784_v8  ;;  %v899_v59 = vld [vmem:[#allocation4 + $0x20] ss:$0 sm:$0xff] }
 0x931   :  { %v1631_v32 = vld [vmem:[#allocation2 + $0x1c0] ss:$8 sps:$4 sm:$0xff]  }
 0x932   :  { %v815_v35 = vsub.f32 %v790_v33, %v814_v34  ;;  %v1632_v33 = vld [vmem:[#allocation2 + $0x250] ss:$8 sps:$4 sm:$0xff]  }
 0x933   :  { %v1633_v34 = vld [vmem:[#allocation2 + $0x1d0] ss:$8 sps:$4 sm:$0xff]  }
 0x934   :  { %v817_v37 = vadd.f32 %v816_v36, %v815_v35  ;;  %v1634_v35 = vld [vmem:[#allocation2 + $0x260] ss:$8 sps:$4 sm:$0xff]  }
 0x935   :  { %v1635_v36 = vld [vmem:[#allocation2 + $0x1e0] ss:$8 sps:$4 sm:$0xff]  }
 0x936   :  { %v818_v1 = vmax.f32 %v817_v37, 0.0  ;;  %v1636_v37 = vld [vmem:[#allocation2 + $0x270] ss:$8 sps:$4 sm:$0xff]  }
 0x938   :  { %v819_v19 = vpack.c.bf16 %v818_v1, %v818_v1  ;;  %v1637_v1 = vld [vmem:[#allocation2 + $0x1f0] ss:$8 sps:$4 sm:$0xff]  }
 0x93a   :  { %1554 = vmatmul.mubr.msk.bf16.vlgmr.msra.gmra.mrb[16].mxu0 %vm165_vm1, %v819_v19  ;;  %v1638_v19 = vld [vmem:[#allocation2 + $0x280] ss:$8 sps:$4 sm:$0xff]  }
 0x93b   :  { %1464 = vmatpush3.bf16.msra.mxu0 %v1631_v32 }
 0x93c   :  { %1465 = vmatprep.subr.bf16.mxu0 %v1632_v33  ;;  %v1736_v33 = vmov 1966171168  }
 0x93f   :  { %1466 = vmatpush3.bf16.msra.mxu0 %v1633_v34  ;;  %v1125_v34 = vunpack.c.l.s4 %v1736_v33 }
 0x940   :  { %1467 = vmatprep.subr.bf16.mxu0 %v1634_v35 }
 0x941   :  { %v1126_v35 = vunpack.c.0.s8 %v1125_v34 }
 0x943   :  { %1468 = vmatpush3.bf16.msra.mxu0 %v1635_v36 }
 0x944   :  { %1469 = vmatprep.subr.bf16.mxu0 %v1636_v37  ;;  %v1129_v37 = vsub.s32 %v1126_v35, %v1822_v13 }
 0x947   :  { %1470 = vmatpush3.bf16.msra.mxu0 %v1637_v1 }
 0x948   :  { %1471 = vmatprep.subr.bf16.mxu0 %v1638_v19 }
 0x94b   :  { %1472 = vmatpush3.bf16.msra.mxu0 %v1639_v20 }
 0x94c   :  { %1473 = vmatprep.subr.bf16.mxu0 %v1640_v39  ;;  %v1078_v39 = vld [vmem:[#allocation4 + $0x5] ss:$8 sm:$0x3] }
 0x94f   :  { %1474 = vmatpush3.bf16.msra.mxu0 %v1641_v42 }
 0x950   :  { %1475 = vmatprep.subr.bf16.mxu0 %v1642_v22 }
 0x953   :  { %1476 = vmatpush3.bf16.msra.mxu0 %v1643_v43 }
 0x954   :  { %1477 = vmatprep.subr.bf16.mxu0 %v1644_v24 }
 0x957   :  { %1478 = vmatpush3.bf16.msra.mxu0 %v1645_v27 }
 0xa0d   :  { %v889_v48 = vpop.f32.mrb[16].mxu0 }
 0xa0e   :  { %v895_v50 = vadd.f32 %v889_v48, %v1972_v5  ;;  %v1555_v51 = vpop.f32.mrb[17].mxu0 }
 0xa0f   :  { %v892_v53 = vpop.f32.mrb[18].mxu0 }
 0xa10   :  { %v897_v14 = vadd.f32 %v896_v49, %v895_v50  ;;  %v1556_v54 = vpop.f32.mrb[19].mxu0 }
 0xa12   :  { %v900_v55 = vrot.slane %v897_v14, 4  ;;  %v906_v60 = vmul.f32 %v897_v14, %v897_v14 }
 0xa14   :  { %v901_v8 = vadd.f32 %v900_v55, %v897_v14  ;;  %v907_v11 = vrot.slane %v906_v60, 4 }
 0xa16   :  { %v902_v52 = vrot.slane %v901_v8, 2  ;;  %v908_v0 = vadd.f32 %v907_v11, %v906_v60 }
 0xa18   :  { %v903_v12 = vadd.f32 %v902_v52, %v901_v8  ;;  %v909_v17 = vrot.slane %v908_v0, 2 }
 0xa1a   :  { %v904_v23 = vrot.slane %v903_v12, 1  ;;  %v910_v25 = vadd.f32 %v909_v17, %v908_v0 }
 0xa1c   :  { %v905_v26 = vadd.f32 %v904_v23, %v903_v12  ;;  %v911_v63 = vrot.slane %v910_v25, 1 }
 0xa1e   :  { %v912_v21 = vadd.f32 %v911_v63, %v910_v25  ;;  %v913_v56 = vmul.f32 0.125, %v905_v26 }
 0xa20   :  { %v914_v28 = vmul.f32 0.125, %v912_v21  ;;  %v915_v5 = vmul.f32 %v913_v56, %v913_v56 }
 0xa22   :  { %v916_v57 = vsub.f32 %v914_v28, %v915_v5 }
 0xa24   :  { %v917_v3 = vmax.f32 %v916_v57, 0.0 }
 0xa26   :  { %v918_v4 = vadd.f32 1e-05, %v917_v3 }
 0xa28   :  { %1670 = vrsqrt.f32 %v918_v4 }
 0xa32   :  { %v1671_v6 = vpop.eup %1670 }
 0xa33   :  { %v920_v18 = vmul.f32 %v1671_v6, %v898_v58 }
 0xa35   :  { %v921_v7 = vmul.f32 %v920_v18, %v913_v56  ;;  %v923_v10 = vmul.f32 %v920_v18, %v897_v14 }
 0xa37   :  { %v922_v9 = vsub.f32 %v899_v59, %v921_v7 }
 0xa39   :  { %v924_v29 = vadd.f32 %v923_v10, %v922_v9 }
 0xa3b   :  { %v925_v62 = vmax.f32 %v924_v29, 0.0 }
 0xa3d   :  { %v926_v61 = vpack.c.bf16 %v925_v62, %v925_v62 }
 0xa3f   :  { %1069 = vmatmul.mubr.bf16.vlgmr.msra.gmra.mrb[16].mxu1 %v926_v61 }
 0xb12   :  { %v1070_v2 = vpop.f32.mrb[16].mxu1 }
 0xb13   :  { %v1071_v38 = vadd.f32 %v1070_v2, %v949_v31  ;;  %v1072_v40 = vpop.f32.mrb[17].mxu1 }
 0xb14   :  { %v1073_v45 = vadd.f32 %v1072_v40, %v953_v44  ;;  %v1074_v46 = vpop.f32.mrb[18].mxu1 }
 0xb15   :  { %v1081_v47 = vrot.slane %v1071_v38, 4  ;;  %v1093_v48 = vmul.f32 %v1071_v38, %v1071_v38  ;;  %v1075_v49 = vpop.f32.mrb[19].mxu1  ;;  %v1080_v46 = vld [vmem:[#allocation4 + $0x6] ss:$8 sm:$0x3] }
 0xb16   :  { %v1087_v50 = vrot.slane %v1073_v45, 4  ;;  %v1094_v51 = vmul.f32 %v1073_v45, %v1073_v45 }
 0xb17   :  { %v1082_v53 = vadd.f32 %v1081_v47, %v1071_v38  ;;  %v1095_v14 = vrot.slane %v1093_v48, 4 }
 0xb18   :  { %v1088_v54 = vadd.f32 %v1087_v50, %v1073_v45  ;;  %v1101_v55 = vrot.slane %v1094_v51, 4 }
 0xb19   :  { %v1083_v60 = vrot.slane %v1082_v53, 2  ;;  %v1096_v8 = vadd.f32 %v1095_v14, %v1093_v48 }
 0xb1a   :  { %v1089_v11 = vrot.slane %v1088_v54, 2  ;;  %v1102_v52 = vadd.f32 %v1101_v55, %v1094_v51 }
 0xb1b   :  { %v1084_v0 = vadd.f32 %v1083_v60, %v1082_v53  ;;  %v1097_v12 = vrot.slane %v1096_v8, 2 }
 0xb1c   :  { %v1090_v17 = vadd.f32 %v1089_v11, %v1088_v54  ;;  %v1103_v23 = vrot.slane %v1102_v52, 2 }
 0xb1d   :  { %v1085_v25 = vrot.slane %v1084_v0, 1  ;;  %v1098_v26 = vadd.f32 %v1097_v12, %v1096_v8 }
 0xb1e   :  { %v1091_v63 = vrot.slane %v1090_v17, 1  ;;  %v1104_v21 = vadd.f32 %v1103_v23, %v1102_v52 }
 0xb1f   :  { %v1086_v56 = vadd.f32 %v1085_v25, %v1084_v0  ;;  %v1099_v28 = vrot.slane %v1098_v26, 1 }
 0xb20   :  { %v1092_v5 = vadd.f32 %v1091_v63, %v1090_v17  ;;  %v1105_v57 = vrot.slane %v1104_v21, 1 }
 0xb21   :  { %v1100_v3 = vadd.f32 %v1099_v28, %v1098_v26  ;;  %v1107_v4 = vmul.f32 0.125, %v1086_v56 }
 0xb22   :  { %v1106_v58 = vadd.f32 %v1105_v57, %v1104_v21  ;;  %v1108_v6 = vmul.f32 0.125, %v1092_v5 }
 0xb23   :  { %v1109_v18 = vmul.f32 0.125, %v1100_v3  ;;  %v1111_v59 = vmul.f32 %v1107_v4, %v1107_v4 }
 0xb24   :  { %v1110_v7 = vmul.f32 0.125, %v1106_v58  ;;  %v1112_v9 = vmul.f32 %v1108_v6, %v1108_v6 }
 0xb25   :  { %v1113_v10 = vsub.f32 %v1109_v18, %v1111_v59 }
 0xb26   :  { %v1114_v29 = vsub.f32 %v1110_v7, %v1112_v9 }
 0xb27   :  { %v1115_v62 = vmax.f32 %v1113_v10, 0.0 }
 0xb28   :  { %v1116_v61 = vmax.f32 %v1114_v29, 0.0 }
 0xb29   :  { %v1117_v30 = vadd.f32 1e-05, %v1115_v62 }
 0xb2a   :  { %v1118_v32 = vadd.f32 1e-05, %v1116_v61 }
 0xb2b   :  { %1672 = vrsqrt.f32 %v1117_v30 }
 0xb2c   :  { %1674 = vrsqrt.f32 %v1118_v32 }
 0xb35   :  { %v1673_v36 = vpop.eup %1672 }
 0xb36   :  { %v1675_v1 = vpop.eup %1674 }
 0xb37   :  { %v1123_v19 = vcombine.low %v1673_v36, %v1675_v1 }
 0xb39   :  { %v1130_v20 = vrot.slane %v1123_v19, %v1129_v37 }
 0xb3b   :  { %v1137_v42 = vrot.slane %v1130_v20, %v1129_v37 }
 0xb3d   :  { %v1139_v22 = vmul.f32 %v1137_v42, %v1078_v39 }
 0xb3f   :  { %v1144_v43 = vrot.slane %v1139_v22, %v1825_v15  ;;  %v1148_v24 = vrot.slane %v1139_v22, %v1828_v16 }
 0xb41   :  { %v1151_v27 = vmul.f32 %v1144_v43, %v1107_v4  ;;  %v1152_v41 = vmul.f32 %v1148_v24, %v1108_v6  ;;  %v1173_v31 = vmul.f32 %v1148_v24, %v1073_v45  ;;  %v1172_v44 = vmul.f32 %v1144_v43, %v1071_v38  ;;  %v1223_v45 = vld [vmem:[#allocation4 + $0x21] ss:$0 sm:$0xff] }
 0xb43   :  { %v1155_v2 = vcombine.low %v1151_v27, %v1152_v41 }
 0xb45   :  { %v1162_v40 = vrot.slane %v1155_v2, %v1129_v37 }
 0xb47   :  { %v1169_v47 = vrot.slane %v1162_v40, %v1129_v37 }
 0xb49   :  { %v1171_v48 = vsub.f32 %v1080_v46, %v1169_v47 }
 0xb4b   :  { %v1182_v13 = vrot.slane %v1171_v48, %v1828_v16  ;;  %v1178_v49 = vrot.slane %v1171_v48, %v1825_v15 }
 0xb4d   :  { %v1186_v50 = vadd.f32 %v1182_v13, %v1173_v31  ;;  %v1185_v51 = vadd.f32 %v1178_v49, %v1172_v44 }
 0xb4f   :  { %v1188_v53 = vmax.f32 %v1186_v50, 0.0  ;;  %v1187_v14 = vmax.f32 %v1185_v51, 0.0 }
 0xb51   :  { %v1190_v54 = vpack.c.bf16 %v1188_v53, %v1188_v53  ;;  %v1189_v55 = vpack.c.bf16 %v1187_v14, %v1187_v14 }
 0xb53   :  { %1352 = vmatprep.mubr.bf16.mxu0 %v1190_v54 }
 0xb54   :  { %1353 = vmatmul.mubr.bf16.vlgmr.msra.gmra.mrb[20].mxu0 %v1189_v55 }
 0xc27   :  { %v1479_v60 = vpop.f32.mrb[20].mxu0 }
 0xc28   :  { %v1480_v38 = vpop.f32.mrb[21].mxu0 }
 0xc29   :  { %v1481_v8 = vadd.f32 %v1480_v38, %v1479_v60  ;;  %v1482_v11 = vpop.f32.mrb[22].mxu0 }
 0xc2a   :  { %v1483_v52 = vpop.f32.mrb[23].mxu0 }
 0xc2b   :  { %v1355_v0 = vadd.f32 %v1481_v8, %v1223_v45 }
 0xc2d   :  { %1360 = vst [vmem:[%s2009_s3] sm:$0xff] %v1355_v0 }
 0xc2e   :  { %1365 = vsyncpa [#allocation3], 1 }
 0xc2f   :  { %1366 = vsyncpa [#allocation5], 1 }

</bundles_post_ra>
